<compile_context>
chip_gen: v5e
topology: v5e:2x2
jax: 0.10.0
libtpu: 0.0.40
codegen_flags: <defaults>
</compile_context>

<pallas_src>
import jax
import jax.numpy as jnp
from jax.experimental import pallas as pl
from jax.experimental.pallas import tpu as pltpu

_TARGET_BLOCK_BYTES = 4 << 20   # ~4 MiB per z/out block
_SMALL_INPUT_BYTES = 256 << 10  # below this, plain JAX beats pallas launch overhead
_LANE = 128


def _sublane_pack(dtype):
    # Rows per packed sublane tile: 8 for 32-bit, 16 for 16-bit, 32 for 8-bit.
    return max(8, 32 // jnp.dtype(dtype).itemsize)


def _vmem_limit_bytes():
    # Generation-aware scoped-VMEM budget: leave headroom on v7x's 64 MiB part,
    # go bigger on v5e/v6e's 128 MiB parts.
    cap = 128 << 20
    try:
        info = pltpu.get_tpu_info()
        cap = int(getattr(info, "vmem_capacity_bytes", cap) or cap)
    except Exception:
        pass
    if cap <= (64 << 20):
        return 40 << 20   # v7x
    return 64 << 20       # v5e / v6e


def _mask_layer_kernel(z_ref, scale_ref, bias_ref, o_ref):
    # z_ref/o_ref: (tm, tn) tile; scale_ref/bias_ref: (1, tn) broadcast over rows.
    o_ref[...] = (z_ref[...] * scale_ref[...] + bias_ref[...]).astype(o_ref.dtype)


def mask_layer_forward(z, mask, intervention=None):
    """z: (B, S, D); mask: (D,); intervention: {idx: value} or None."""
    B, S, D = z.shape
    dtype = z.dtype
    itemsize = jnp.dtype(dtype).itemsize
    pack = _sublane_pack(dtype)

    # --- fold intervention + mask into scale/bias (plain JAX glue, traced) ---
    sel = jnp.zeros((D,), jnp.float32)
    ival = jnp.zeros((D,), jnp.float32)
    if intervention is not None:
        for idx, value in intervention.items():
            sel = sel.at[idx].set(1.0)
            ival = ival.at[idx].set(value)   # works for traced JAX scalars too
    mask_f = mask.astype(jnp.float32)
    scale = (mask_f * (1.0 - sel)).astype(dtype)   # keeps z where not intervened
    bias = (mask_f * ival).astype(dtype)           # mask * value where intervened

    # --- tiny inputs: skip Pallas, let XLA fuse the affine ---
    if B * S * D * itemsize < _SMALL_INPUT_BYTES:
        return z * scale.reshape(1, 1, -1) + bias.reshape(1, 1, -1)

    # --- pick a lane-dense 2D layout ---
    pad = 0
    if D % _LANE == 0:
        rows, width = B * S, D
        z2 = z.reshape(rows, width)
        scale_row, bias_row = scale, bias
    elif (S * D) % _LANE == 0 or S * D * itemsize * pack <= _TARGET_BLOCK_BYTES:
        # Either the flattened row is itself lane-aligned (tileable along width),
        # or a full-width row block fits the budget with tm >= pack.
        rows, width = B, S * D
        z2 = z.reshape(rows, width)
        scale_row = jnp.tile(scale, S)
        bias_row = jnp.tile(bias, S)
    else:
        # D not lane-aligned and S*D too big for a full-width block:
        # pad D up to a multiple of 128, slice the padding off afterwards.
        pad = (-D) % _LANE
        rows, width = B * S, D + pad
        z2 = jnp.pad(z, ((0, 0), (0, 0), (0, pad))).reshape(rows, width)
        scale_row = jnp.pad(scale, (0, pad))
        bias_row = jnp.pad(bias, (0, pad))

    scale2 = scale_row.reshape(1, width)
    bias2 = bias_row.reshape(1, width)

    # --- tile sizes: ~4 MiB per z/out block, (8,128)-aligned, pack-aligned rows ---
    if width % _LANE == 0:
        max_tn = max(_LANE, ((_TARGET_BLOCK_BYTES // (pack * itemsize)) // _LANE) * _LANE)
        tn = min(width, max_tn)
    else:
        tn = width   # full extent is always legal
    n_j = pl.cdiv(width, tn)

    tm = max(1, _TARGET_BLOCK_BYTES // (tn * itemsize))
    # Guarantee >=2 (ideally >=4) parallel blocks so v7x's 2nd TensorCore has work.
    if n_j == 1 and rows >= 2 * pack:
        want = 4 if rows >= 4 * pack else 2
        tm = min(tm, pl.cdiv(rows, want))
    if tm >= rows:
        tm = rows
    else:
        tm = max(pack, (tm // pack) * pack)
    n_i = pl.cdiv(rows, tm)

    # Width outermost, rows innermost -> scale/bias block index is constant across
    # consecutive steps, so their re-DMA is elided.
    grid = (n_j, n_i)

    cost = pl.CostEstimate(
        flops=2 * rows * width,
        transcendentals=0,
        bytes_accessed=(2 * rows * width + 2 * width) * itemsize,
    )

    out2 = pl.pallas_call(
        _mask_layer_kernel,
        out_shape=jax.ShapeDtypeStruct((rows, width), dtype),
        grid=grid,
        in_specs=[
            pl.BlockSpec((tm, tn), lambda j, i: (i, j)),
            pl.BlockSpec((1, tn), lambda j, i: (0, j)),
            pl.BlockSpec((1, tn), lambda j, i: (0, j)),
        ],
        out_specs=pl.BlockSpec((tm, tn), lambda j, i: (i, j)),
        compiler_params=pltpu.CompilerParams(
            dimension_semantics=("parallel", "parallel"),
            vmem_limit_bytes=_vmem_limit_bytes(),
        ),
        cost_estimate=cost,
    )(z2, scale2, bias2)

    if pad:
        return out2.reshape(B, S, D + pad)[:, :, :D]
    return out2.reshape(B, S, D)


def _reference(z, mask, intervention=None):
    if intervention is not None:
        for idx, value in intervention.items():
            z = z.at[:, :, idx].set(value)
    return z * mask.reshape(1, 1, -1)


if __name__ == "__main__":
    key = jax.random.PRNGKey(0)

    # --- 1) small shape, D < 128 (tiny-input bypass path) ---
    B, S, D = 2, 8, 32
    k1, k2, key = jax.random.split(key, 3)
    z = jax.random.normal(k1, (B, S, D), dtype=jnp.float32)
    mask = jnp.ones((D,), jnp.float32)  # nn.Parameter(torch.ones(dim))

    out = jax.block_until_ready(mask_layer_forward(z, mask, intervention=None))
    assert jnp.allclose(out, _reference(z, mask), atol=1e-6), "no-intervention mismatch"

    intervention = {3: 0.5, 7: -1.25}
    out_i = jax.block_until_ready(mask_layer_forward(z, mask, intervention=intervention))
    assert jnp.allclose(out_i, _reference(z, mask, intervention), atol=1e-6), \
        "intervention mismatch"

    # --- 2) larger shape, D % 128 == 0 (row-tiled (B*S, D) Pallas path) ---
    B2, S2, D2 = 4, 1024, 256
    k3, k4, key = jax.random.split(k2, 3)
    z_big = jax.random.normal(k3, (B2, S2, D2), dtype=jnp.float32)
    mask_big = jax.random.uniform(k4, (D2,), dtype=jnp.float32)
    interv_big = {0: 2.0, 100: -3.0, 255: 0.125}
    out_big = jax.block_until_ready(
        mask_layer_forward(z_big, mask_big, intervention=interv_big))
    assert jnp.allclose(out_big, _reference(z_big, mask_big, interv_big), atol=1e-5), \
        "large-shape mismatch"

    # --- 3) D % 128 != 0 with large S*D (padded (B*S, D_pad) Pallas path) ---
    B3, S3, D3 = 2, 4096, 96
    k5, k6, key = jax.random.split(key, 3)
    z_pad = jax.random.normal(k5, (B3, S3, D3), dtype=jnp.float32)
    mask_pad = jax.random.uniform(k6, (D3,), dtype=jnp.float32)
    interv_pad = {5: 1.5, 95: -0.75}
    out_pad = jax.block_until_ready(
        mask_layer_forward(z_pad, mask_pad, intervention=interv_pad))
    assert jnp.allclose(out_pad, _reference(z_pad, mask_pad, interv_pad), atol=1e-5), \
        "padded-shape mismatch"

    # --- 4) bf16 sanity check (sublane packing = 16, extra-rounding tolerance) ---
    B4, S4, D4 = 2, 512, 256
    k7, k8 = jax.random.split(key)
    z_bf = jax.random.normal(k7, (B4, S4, D4), dtype=jnp.bfloat16)
    mask_bf = jax.random.uniform(k8, (D4,), dtype=jnp.bfloat16)
    interv_bf = {1: 0.5, 200: -2.0}
    out_bf = jax.block_until_ready(
        mask_layer_forward(z_bf, mask_bf, intervention=interv_bf))
    ref_bf = _reference(z_bf, mask_bf, interv_bf)
    assert jnp.allclose(out_bf.astype(jnp.float32), ref_bf.astype(jnp.float32),
                        atol=5e-2), "bf16 mismatch"

    print("KERNEL_OK")
</pallas_src>

<mosaic_0001>
module attributes {stable_mosaic.version = 11 : i64} {
  func.func @_mask_layer_kernel(%arg0: i32, %arg1: i32, %arg2: memref<1024x256xf32, #tpu.memory_space<vmem>>, %arg3: memref<1x256xf32, #tpu.memory_space<vmem>>, %arg4: memref<1x256xf32, #tpu.memory_space<vmem>>, %arg5: memref<1024x256xf32, #tpu.memory_space<vmem>>) attributes {dimension_semantics = [#tpu.dimension_semantics<parallel>, #tpu.dimension_semantics<parallel>], iteration_bounds = array<i64: 1, 4>, scalar_prefetch = 0 : i64, scratch_operands = 0 : i64, tpu.core_type = #tpu.core_type<tc>, window_params = [{transform_indices = @transform_0, window_bounds = array<i64: 1024, 256>}, {transform_indices = @transform_1, window_bounds = array<i64: 1, 256>}, {transform_indices = @transform_2, window_bounds = array<i64: 1, 256>}, {transform_indices = @transform_3, window_bounds = array<i64: 1024, 256>}]} {
    %c0 = arith.constant 0 : index
    %c0_0 = arith.constant 0 : index
    %0 = vector.load %arg2[%c0, %c0_0] : memref<1024x256xf32, #tpu.memory_space<vmem>>, vector<1024x256xf32>
    %c0_1 = arith.constant 0 : index
    %c0_2 = arith.constant 0 : index
    %1 = vector.load %arg3[%c0_1, %c0_2] : memref<1x256xf32, #tpu.memory_space<vmem>>, vector<1x256xf32>
    %2 = vector.broadcast %1 : vector<1x256xf32> to vector<1024x256xf32>
    %3 = arith.mulf %0, %2 : vector<1024x256xf32>
    %c0_3 = arith.constant 0 : index
    %c0_4 = arith.constant 0 : index
    %4 = vector.load %arg4[%c0_3, %c0_4] : memref<1x256xf32, #tpu.memory_space<vmem>>, vector<1x256xf32>
    %5 = vector.broadcast %4 : vector<1x256xf32> to vector<1024x256xf32>
    %6 = arith.addf %3, %5 : vector<1024x256xf32>
    %c0_5 = arith.constant 0 : index
    %c0_6 = arith.constant 0 : index
    %7 = vector.load %arg5[%c0_5, %c0_6] : memref<1024x256xf32, #tpu.memory_space<vmem>>, vector<1024x256xf32>
    tpu.vector_store %arg5[%c0_5, %c0_6], %6 {strides = array<i32>} : memref<1024x256xf32, #tpu.memory_space<vmem>>, vector<1024x256xf32>,
    return
  }
  func.func @transform_0(%arg0: i32, %arg1: i32) -> (i32, i32) {
    %c0_i32 = arith.constant 0 : i32
    return %arg1, %arg0 : i32, i32
  }
  func.func @transform_1(%arg0: i32, %arg1: i32) -> (i32, i32) {
    %c0_i32 = arith.constant 0 : i32
    %c0_i32_0 = arith.constant 0 : i32
    return %c0_i32, %arg0 : i32, i32
  }
  func.func @transform_2(%arg0: i32, %arg1: i32) -> (i32, i32) {
    %c0_i32 = arith.constant 0 : i32
    %c0_i32_0 = arith.constant 0 : i32
    return %c0_i32, %arg0 : i32, i32
  }
  func.func @transform_3(%arg0: i32, %arg1: i32) -> (i32, i32) {
    %c0_i32 = arith.constant 0 : i32
    return %arg1, %arg0 : i32, i32
  }
}

</mosaic_0001>

<bundles_post_ra>
// kernel: tpu_custom_call.1
= control target key start
LH: loop header
LB: loop body
LE: loop exit
PB: predicated region body
PF: predicated region fallthrough
CT: control target
= control target key end

     0   :  { %s2933_s0 = inlined_call_operand.hbm [shape: f32[4096,256], index: 0, kind: input, shape index: {}]   ;;  %s2934_s1 = inlined_call_operand.hbm [shape: f32[1,256], index: 1, kind: input, shape index: {}]   ;;  %s2935_s2 = inlined_call_operand.hbm [shape: f32[1,256], index: 2, kind: input, shape index: {}]   ;;  %s2936_s3 = inlined_call_operand.hbm [shape: f32[4096,256], index: 3, kind: output, shape index: {}]  }
   0x1   :  { %2937 = sst [smem:[#allocation12_spill]] %s2934_s1 }
   0x2   :  { %8 = vsyncpa [#allocation3], 0 }
   0x3   :  { %10 = vsyncpa [#allocation3 + $0x1], 0 }
   0x4   :  { %11 = vsyncpa [#allocation6], 0 }
   0x5   :  { %12 = vsyncpa [#allocation4], 0 }
   0x6   :  { %14 = vsyncpa [#allocation4 + $0x1], 0  ;;  %s1740_s12 = smov 0   ;;  %s1742_s13 = smov 0  }
   0x7   :  { %s1744_s14 = smov 0   ;;  %s1746_s15 = smov 0  }
   0x8   :  { %s1748_s16 = smov 0   ;;  %s1750_s17 = smov 0  }
   0x9 LB: > { %s1424_s18 = sadd.s32 4294967295, %s1712_s17   ;;  %s1425_s19 = sadd.s32 4294967294, %s1712_s17   ;;  %s1712_s17 = sphi %s1750_s17, %s20_s17   ;;  %s1708_s16 = sphi %s1748_s16, %s2950_s16   ;;  %s1704_s15 = sphi %s1746_s15, %s2949_s15   ;;  %s1700_s14 = sphi %s1744_s14, %s2948_s14   ;;  %s1696_s13 = sphi %s1742_s13, %s2947_s13   ;;  %s1692_s12 = sphi %s1740_s12, %s2946_s12  }
   0xa   : > { %s41_s20 = sadd.s32 1, %s1700_s14  ;;  %p48_p0 = scmp.ne.s32.totalorder %s1700_s14, %s1696_s13 }
   0xb   : > { %p49_p1 = scmp.eq.s32.totalorder %s1712_s17, 0  ;;  %p54_p2 = scmp.ne.s32.totalorder %s1696_s13, %s1692_s12 }
   0xc   : > { %p1778_p3 = scmp.eq.s32.totalorder %s1424_s18, 0  ;;  %p132_p4 = scmp.eq.s32.totalorder %s1424_s18, 3 }
   0xd   : > { %p1782_p5 = por %p49_p1, %p48_p0  ;;  %p138_p6 = scmp.eq.s32.totalorder %s1425_s19, 3 }
   0xe   : > { %p1788_p7 = por %p1778_p3, %p54_p2  ;;  %p1792_p8 = por %p132_p4, %p48_p0 }
   0xf   : > { %p1796_p9 = por %p138_p6, %p54_p2  ;;  %p1426_p10 = scmp.ge.s32.totalorder %s1712_s17, 1 }
  0x10   : > { %p145_p11 = scmp.lt.s32.totalorder %s1712_s17, 5  ;;  %s2943_s1 = sld [smem:[#allocation12_spill]] }
  0x11   : > { %s1714_s30 = smov [#allocation5]   ;;  %p1478_p0 = scmp.lt.s32.totalorder %s1712_s17, 4 }
  0x12   : > { %p1805_p12 = pnand %p1426_p10, %p145_p11  ;;  %s161_s4 = sshll.u32 %s1714_s30, 4  ;;  %s162_s4 = int_to_ptr.vmem [resolvable:$true] %s161_s4 }
  0x13   : > { %s173_s7 = sshll.u32 %s2935_s2, 4  ;;  %p1819_p2 = pnand %p1478_p0, %p1782_p5  ;;  %s174_s7 = int_to_ptr.hbm [resolvable:$true] %s173_s7 }
  0x14   : > { %p1461_p13 = pneg %p1805_p12  ;;  %s1715_s9 = smov [#allocation7]  }
  0x15   : > { %s175_s10 = sshll.u32 %s1715_s9, 4  ;;  %s186_s11 = sand.u32 1, %s1700_s14   ;;  %s176_s10 = int_to_ptr.vmem [resolvable:$true] %s175_s10 }
  0x16   : > { %s159_s28 = sshll.u32 %s2943_s1, 4  ;;  %p1462_p1 = pnand %p1461_p13, %p1778_p3  ;;  %s160_s28 = int_to_ptr.hbm [resolvable:$true] %s159_s28 }
  0x17   : > { %s29_s18 = sadd.s32 1, %s1708_s16  ;;  %s1430_s19 = sshll.u32 %s186_s11, 11 }
  0x18   : > { %1464 = dma.hbm_to_vmem [thread:$0]  (!%p1462_p1), %s160_s28, 32, %s162_s4, [#allocation6]  }
  0x19   : > { %1467 = dma.hbm_to_vmem [thread:$0]  (!%p1462_p1), %s174_s7, 32, %s176_s10, [#allocation6]  }
  0x1a   : > { %p30_p4 = scmp.ge.s32.totalorder %s29_s18, 4  ;;  %s1446_s26 = sshll.u32 %s1708_s16, 11 }
  0x1b   : > { %s190_s27 = scalar_lea.vmem [#allocation2], %s1430_s19  ;;  %s198_s6 = scalar_lea.hbm %s2933_s0, %s1446_s26 }
  0x1c   : > { %s201_s22 = sshll.u32 %s190_s27, 4  ;;  %s2952_s18 = smov (%p30_p4, %s29_s18), 0  ;;  %s202_s22 = int_to_ptr.vmem [resolvable:$true] %s201_s22 }
  0x1d   : > { %s36_s28 = ssub.s32 %s1708_s16, %s2952_s18  ;;  %s199_s4 = sshll.u32 %s198_s6, 4  ;;  %s200_s4 = int_to_ptr.hbm [resolvable:$true] %s199_s4 }
  0x1e   : > { %p39_p5 = scmp.eq.s32.totalorder %s36_s28, 0  ;;  %s187_s9 = scalar_lea.sflag [#allocation3], %s186_s11 }
  0x1f   : > { %s1716_s10 = smov 256   ;;  %s1717_s1 = smov 16  }
  0x20   : > { %s1836_s7 = scalar_select %p39_p5, %s1700_s14, %s41_s20  }
  0x21   : > { %1471 = dma.hbm_to_vmem [thread:$0]  (!%p1819_p2), %s200_s4, 32768, %s202_s22, %s187_s9, %s1716_s10, %s1716_s10, %s1717_s1  }
  0x22   : > { %213 = sbr.rel (%p1805_p12) target bundleno = 309 (0x135), region = 32  ;;  %s1843_s19 = sand.u32 (!%p1805_p12), 1, %s1696_s13  }
  0x23   : > { %s1435_s26 = sshll.u32 (!%p1805_p12), %s1843_s19, 11  ;;  %s216_s27 = scalar_lea.sflag (!%p1805_p12), [#allocation3], %s1843_s19 }
  0x24   : > { %s1849_s20 = scalar_lea.vmem (!%p1805_p12), [#allocation2], %s1435_s26 }
  0x27   : > { %1679 = dma.done.wait (%p1788_p7), %s216_s27, 32768  }
  0x28   : > { %1681 = vsyncadd (%p1788_p7), %s216_s27, 4294934528 }
  0x29   : > { %1683 = dma.done.wait (%p1778_p3), [#allocation6], 64  }
  0x2a   : > { %1685 = vsyncadd (%p1778_p3), [#allocation6], 4294967232  ;;  %v259_v0 = vld [vmem:[%s1849_s20] sm:$0xff]  ;;  %v260_v5 = vld [vmem:[%s1849_s20 + $0x8] sm:$0xff]  ;;  %s1892_s1 = scalar_lea.vmem [#allocation8], %s1435_s26  ;;  %s1448_s21 = sshll.u32 %s1704_s15, 11 }
  0x2b   : > { %v515_v1 = vld [vmem:[#allocation5] sm:$0x3]  ;;  %v777_v2 = vld [vmem:[#allocation7] sm:$0x3]  ;;  %v261_v8 = vld [vmem:[%s1849_s20 + $0x10] sm:$0xff]  ;;  %s1310_s29 = scalar_lea.hbm %s2936_s3, %s1448_s21  ;;  %s1311_s8 = sshll.u32 %s1892_s1, 4  ;;  %s1312_s8 = int_to_ptr.vmem [resolvable:$true] %s1311_s8 }
  0x2c   : > { %v1860_v3 = vperm.slane %v515_v1, 0  ;;  %v1862_v4 = vperm.slane %v777_v2, 0  ;;  %v1865_v6 = vperm.slane %v515_v1, 1  ;;  %v1867_v7 = vperm.slane %v777_v2, 1  ;;  %v262_v9 = vld [vmem:[%s1849_s20 + $0x18] sm:$0xff]  ;;  %v263_v10 = vld [vmem:[%s1849_s20 + $0x20] sm:$0xff] }
  0x2d   : > { %v264_v11 = vld [vmem:[%s1849_s20 + $0x28] sm:$0xff]  ;;  %v265_v16 = vld [vmem:[%s1849_s20 + $0x30] sm:$0xff]  ;;  %v266_v17 = vld [vmem:[%s1849_s20 + $0x38] sm:$0xff]  ;;  %s1313_s11 = sshll.u32 %s1310_s29, 4  ;;  %s1296_s22 = scalar_lea.sflag [#allocation4], %s1843_s19  ;;  %s1314_s11 = int_to_ptr.hbm [resolvable:$true] %s1313_s11 }
  0x2e   : > { %v521_v12 = vmul.f32 %v1860_v3, %v259_v0  ;;  %v522_v13 = vmul.f32 %v1865_v6, %v260_v5  ;;  %v523_v14 = vmul.f32 %v1860_v3, %v261_v8  ;;  %v524_v15 = vmul.f32 %v1865_v6, %v262_v9  ;;  %v267_v20 = vld [vmem:[%s1849_s20 + $0x40] sm:$0xff]  ;;  %v268_v25 = vld [vmem:[%s1849_s20 + $0x48] sm:$0xff]  ;;  %v269_v28 = vld [vmem:[%s1849_s20 + $0x50] sm:$0xff]  ;;  %s1640_s30 = sshra.s32 %s1314_s11, 4  ;;  %s1646_s4 = scalar_lea.hbm %s2936_s3, 8192  ;;  %s1641_s30 = int_to_ptr.hbm [resolvable:$true] %s1640_s30 }
  0x2f   : > { %v525_v18 = vmul.f32 %v1860_v3, %v263_v10  ;;  %v526_v19 = vmul.f32 %v1865_v6, %v264_v11  ;;  %v527_v24 = vmul.f32 %v1860_v3, %v265_v16  ;;  %v528_v27 = vmul.f32 %v1865_v6, %v266_v17  ;;  %v270_v31 = vld [vmem:[%s1849_s20 + $0x58] sm:$0xff]  ;;  %v271_v34 = vld [vmem:[%s1849_s20 + $0x60] sm:$0xff]  ;;  %v272_v37 = vld [vmem:[%s1849_s20 + $0x68] sm:$0xff]  ;;  %s1642_s5 = scalar_lea.hbm %s1641_s30, 2048  ;;  %p1647_p10 = scmp.lt.s32.totalorder %s1641_s30, %s2936_s3 }
  0x30   : > { %v783_v21 = vadd.f32 %v1862_v4, %v521_v12  ;;  %v784_v22 = vadd.f32 %v1867_v7, %v522_v13  ;;  %v785_v23 = vadd.f32 %v1862_v4, %v523_v14  ;;  %v786_v26 = vadd.f32 %v1867_v7, %v524_v15  ;;  %v273_v40 = vld [vmem:[%s1849_s20 + $0x70] sm:$0xff]  ;;  %v274_v43 = vld [vmem:[%s1849_s20 + $0x78] sm:$0xff]  ;;  %v275_v46 = vld [vmem:[%s1849_s20 + $0x80] sm:$0xff]  ;;  %p1643_p3 = scmp.ne.s32.totalorder %s1641_s30, %s1642_s5  ;;  %p1648_p11 = scmp.lt.s32.totalorder %s1646_s4, %s1642_s5 }
  0x31   : > { %v787_v29 = vadd.f32 %v1862_v4, %v525_v18  ;;  %v529_v30 = vmul.f32 %v1860_v3, %v267_v20  ;;  %v788_v32 = vadd.f32 %v1867_v7, %v526_v19  ;;  %v530_v33 = vmul.f32 %v1865_v6, %v268_v25  ;;  %v276_v49 = vld [vmem:[%s1849_s20 + $0x88] sm:$0xff]  ;;  %v277_v52 = vld [vmem:[%s1849_s20 + $0x90] sm:$0xff]  ;;  %v278_v55 = vld [vmem:[%s1849_s20 + $0x98] sm:$0xff] }
  0x32   : > { %1039 = vst [vmem:[%s1892_s1] sm:$0xff] %v783_v21  ;;  %v789_v35 = vadd.f32 %v1862_v4, %v527_v24  ;;  %v531_v36 = vmul.f32 %v1860_v3, %v269_v28  ;;  %v790_v38 = vadd.f32 %v1867_v7, %v528_v27  ;;  %v532_v39 = vmul.f32 %v1865_v6, %v270_v31  ;;  %v279_v58 = vld [vmem:[%s1849_s20 + $0xa0] sm:$0xff]  ;;  %v280_v61 = vld [vmem:[%s1849_s20 + $0xa8] sm:$0xff]  ;;  %v281_v0 = vld [vmem:[%s1849_s20 + $0xb0] sm:$0xff]  ;;  %p1644_p6 = pnand %p1643_p3, %p1792_p8  ;;  %p1649_p12 = por %p1648_p11, %p1647_p10 }
  0x33   : > { %1040 = vst [vmem:[%s1892_s1 + $0x8] sm:$0xff] %v784_v22  ;;  %v791_v41 = vadd.f32 %v1862_v4, %v529_v30  ;;  %v533_v42 = vmul.f32 %v1860_v3, %v271_v34  ;;  %v792_v44 = vadd.f32 %v1867_v7, %v530_v33  ;;  %v534_v45 = vmul.f32 %v1865_v6, %v272_v37  ;;  %v282_v5 = vld [vmem:[%s1849_s20 + $0xb8] sm:$0xff]  ;;  %v283_v10 = vld [vmem:[%s1849_s20 + $0xc0] sm:$0xff]  ;;  %v284_v13 = vld [vmem:[%s1849_s20 + $0xc8] sm:$0xff] }
  0x34   : > { %1041 = vst [vmem:[%s1892_s1 + $0x10] sm:$0xff] %v785_v23  ;;  %v793_v47 = vadd.f32 %v1862_v4, %v531_v36  ;;  %v535_v48 = vmul.f32 %v1860_v3, %v273_v40  ;;  %v794_v50 = vadd.f32 %v1867_v7, %v532_v39  ;;  %v536_v51 = vmul.f32 %v1865_v6, %v274_v43  ;;  %v285_v16 = vld [vmem:[%s1849_s20 + $0xd0] sm:$0xff]  ;;  %v286_v19 = vld [vmem:[%s1849_s20 + $0xd8] sm:$0xff]  ;;  %v287_v22 = vld [vmem:[%s1849_s20 + $0xe0] sm:$0xff]  ;;  %p1645_p7 = pneg %p1644_p6 }
  0x35   : > { %1042 = vst [vmem:[%s1892_s1 + $0x18] sm:$0xff] %v786_v26  ;;  %v795_v53 = vadd.f32 %v1862_v4, %v533_v42  ;;  %v537_v54 = vmul.f32 %v1860_v3, %v275_v46  ;;  %v796_v56 = vadd.f32 %v1867_v7, %v534_v45  ;;  %v538_v57 = vmul.f32 %v1865_v6, %v276_v49  ;;  %v288_v25 = vld [vmem:[%s1849_s20 + $0xe8] sm:$0xff]  ;;  %v289_v28 = vld [vmem:[%s1849_s20 + $0xf0] sm:$0xff]  ;;  %v290_v31 = vld [vmem:[%s1849_s20 + $0xf8] sm:$0xff] }
  0x36   : > { %1043 = vst [vmem:[%s1892_s1 + $0x20] sm:$0xff] %v787_v29  ;;  %v797_v59 = vadd.f32 %v1862_v4, %v535_v48  ;;  %v539_v60 = vmul.f32 %v1860_v3, %v277_v52  ;;  %v798_v62 = vadd.f32 %v1867_v7, %v536_v51  ;;  %v540_v63 = vmul.f32 %v1865_v6, %v278_v55  ;;  %v291_v34 = vld [vmem:[%s1849_s20 + $0x100] sm:$0xff]  ;;  %v292_v37 = vld [vmem:[%s1849_s20 + $0x108] sm:$0xff]  ;;  %v293_v40 = vld [vmem:[%s1849_s20 + $0x110] sm:$0xff]  ;;  %p1650_p13 = pnand %p1649_p12, %p1645_p7 }
  0x37   : > { %1044 = vst [vmem:[%s1892_s1 + $0x28] sm:$0xff] %v788_v32  ;;  %v799_v1 = vadd.f32 %v1862_v4, %v537_v54  ;;  %v541_v2 = vmul.f32 %v1860_v3, %v279_v58  ;;  %v800_v8 = vadd.f32 %v1867_v7, %v538_v57  ;;  %v542_v9 = vmul.f32 %v1865_v6, %v280_v61  ;;  %v294_v43 = vld [vmem:[%s1849_s20 + $0x118] sm:$0xff]  ;;  %v295_v46 = vld [vmem:[%s1849_s20 + $0x120] sm:$0xff]  ;;  %v296_v49 = vld [vmem:[%s1849_s20 + $0x128] sm:$0xff] }
  0x38   : > { %1045 = vst [vmem:[%s1892_s1 + $0x30] sm:$0xff] %v789_v35  ;;  %v801_v11 = vadd.f32 %v1862_v4, %v539_v60  ;;  %v543_v12 = vmul.f32 %v1860_v3, %v281_v0  ;;  %v802_v14 = vadd.f32 %v1867_v7, %v540_v63  ;;  %v544_v15 = vmul.f32 %v1865_v6, %v282_v5  ;;  %v297_v52 = vld [vmem:[%s1849_s20 + $0x130] sm:$0xff]  ;;  %v298_v55 = vld [vmem:[%s1849_s20 + $0x138] sm:$0xff]  ;;  %v299_v58 = vld [vmem:[%s1849_s20 + $0x140] sm:$0xff] }
  0x39   : > { %1046 = vst [vmem:[%s1892_s1 + $0x38] sm:$0xff] %v790_v38  ;;  %v803_v17 = vadd.f32 %v1862_v4, %v541_v2  ;;  %v545_v18 = vmul.f32 %v1860_v3, %v283_v10  ;;  %v804_v20 = vadd.f32 %v1867_v7, %v542_v9  ;;  %v546_v21 = vmul.f32 %v1865_v6, %v284_v13  ;;  %v300_v61 = vld [vmem:[%s1849_s20 + $0x148] sm:$0xff]  ;;  %v301_v0 = vld [vmem:[%s1849_s20 + $0x150] sm:$0xff]  ;;  %v302_v5 = vld [vmem:[%s1849_s20 + $0x158] sm:$0xff] }
  0x3a   : > { %1047 = vst [vmem:[%s1892_s1 + $0x40] sm:$0xff] %v791_v41  ;;  %v805_v23 = vadd.f32 %v1862_v4, %v543_v12  ;;  %v547_v24 = vmul.f32 %v1860_v3, %v285_v16  ;;  %v806_v26 = vadd.f32 %v1867_v7, %v544_v15  ;;  %v548_v27 = vmul.f32 %v1865_v6, %v286_v19  ;;  %v303_v10 = vld [vmem:[%s1849_s20 + $0x160] sm:$0xff]  ;;  %v304_v13 = vld [vmem:[%s1849_s20 + $0x168] sm:$0xff]  ;;  %v305_v16 = vld [vmem:[%s1849_s20 + $0x170] sm:$0xff] }
  0x3b   : > { %1048 = vst [vmem:[%s1892_s1 + $0x48] sm:$0xff] %v792_v44  ;;  %v807_v29 = vadd.f32 %v1862_v4, %v545_v18  ;;  %v549_v30 = vmul.f32 %v1860_v3, %v287_v22  ;;  %v808_v32 = vadd.f32 %v1867_v7, %v546_v21  ;;  %v550_v33 = vmul.f32 %v1865_v6, %v288_v25  ;;  %v306_v19 = vld [vmem:[%s1849_s20 + $0x178] sm:$0xff]  ;;  %v307_v22 = vld [vmem:[%s1849_s20 + $0x180] sm:$0xff]  ;;  %v308_v25 = vld [vmem:[%s1849_s20 + $0x188] sm:$0xff] }
  0x3c   : > { %1049 = vst [vmem:[%s1892_s1 + $0x50] sm:$0xff] %v793_v47  ;;  %v809_v35 = vadd.f32 %v1862_v4, %v547_v24  ;;  %v551_v36 = vmul.f32 %v1860_v3, %v289_v28  ;;  %v810_v38 = vadd.f32 %v1867_v7, %v548_v27  ;;  %v552_v39 = vmul.f32 %v1865_v6, %v290_v31  ;;  %v309_v28 = vld [vmem:[%s1849_s20 + $0x190] sm:$0xff]  ;;  %v310_v31 = vld [vmem:[%s1849_s20 + $0x198] sm:$0xff] }
  0x3d   : > { %1050 = vst [vmem:[%s1892_s1 + $0x58] sm:$0xff] %v794_v50  ;;  %v811_v41 = vadd.f32 %v1862_v4, %v549_v30  ;;  %v553_v42 = vmul.f32 %v1860_v3, %v291_v34  ;;  %v812_v44 = vadd.f32 %v1867_v7, %v550_v33  ;;  %v554_v45 = vmul.f32 %v1865_v6, %v292_v37  ;;  %v311_v34 = vld [vmem:[%s1849_s20 + $0x1a0] sm:$0xff]  ;;  %v312_v37 = vld [vmem:[%s1849_s20 + $0x1a8] sm:$0xff] }
  0x3e   : > { %1051 = vst [vmem:[%s1892_s1 + $0x60] sm:$0xff] %v795_v53  ;;  %v813_v47 = vadd.f32 %v1862_v4, %v551_v36  ;;  %v555_v48 = vmul.f32 %v1860_v3, %v293_v40  ;;  %v814_v50 = vadd.f32 %v1867_v7, %v552_v39  ;;  %v556_v51 = vmul.f32 %v1865_v6, %v294_v43  ;;  %v313_v40 = vld [vmem:[%s1849_s20 + $0x1b0] sm:$0xff]  ;;  %v314_v43 = vld [vmem:[%s1849_s20 + $0x1b8] sm:$0xff] }
  0x3f   : > { %1052 = vst [vmem:[%s1892_s1 + $0x68] sm:$0xff] %v796_v56  ;;  %v815_v53 = vadd.f32 %v1862_v4, %v553_v42  ;;  %v557_v54 = vmul.f32 %v1860_v3, %v295_v46  ;;  %v816_v56 = vadd.f32 %v1867_v7, %v554_v45  ;;  %v558_v57 = vmul.f32 %v1865_v6, %v296_v49  ;;  %v315_v46 = vld [vmem:[%s1849_s20 + $0x1c0] sm:$0xff]  ;;  %v316_v49 = vld [vmem:[%s1849_s20 + $0x1c8] sm:$0xff] }
  0x40   : > { %1053 = vst [vmem:[%s1892_s1 + $0x70] sm:$0xff] %v797_v59  ;;  %v817_v59 = vadd.f32 %v1862_v4, %v555_v48  ;;  %v559_v60 = vmul.f32 %v1860_v3, %v297_v52  ;;  %v560_v63 = vmul.f32 %v1865_v6, %v298_v55  ;;  %v561_v2 = vmul.f32 %v1860_v3, %v299_v58  ;;  %v317_v52 = vld [vmem:[%s1849_s20 + $0x1d0] sm:$0xff]  ;;  %v318_v55 = vld [vmem:[%s1849_s20 + $0x1d8] sm:$0xff]  ;;  %v319_v58 = vld [vmem:[%s1849_s20 + $0x1e0] sm:$0xff] }
  0x41   : > { %1054 = vst [vmem:[%s1892_s1 + $0x78] sm:$0xff] %v798_v62  ;;  %v818_v62 = vadd.f32 %v1867_v7, %v556_v51  ;;  %v562_v9 = vmul.f32 %v1865_v6, %v300_v61  ;;  %v563_v12 = vmul.f32 %v1860_v3, %v301_v0  ;;  %v564_v15 = vmul.f32 %v1865_v6, %v302_v5  ;;  %v320_v61 = vld [vmem:[%s1849_s20 + $0x1e8] sm:$0xff]  ;;  %v321_v0 = vld [vmem:[%s1849_s20 + $0x1f0] sm:$0xff]  ;;  %v322_v5 = vld [vmem:[%s1849_s20 + $0x1f8] sm:$0xff] }
  0x42   : > { %1055 = vst [vmem:[%s1892_s1 + $0x80] sm:$0xff] %v799_v1  ;;  %v819_v1 = vadd.f32 %v1862_v4, %v557_v54  ;;  %v565_v18 = vmul.f32 %v1860_v3, %v303_v10  ;;  %v566_v21 = vmul.f32 %v1865_v6, %v304_v13  ;;  %v567_v24 = vmul.f32 %v1860_v3, %v305_v16  ;;  %v323_v10 = vld [vmem:[%s1849_s20 + $0x200] sm:$0xff]  ;;  %v324_v13 = vld [vmem:[%s1849_s20 + $0x208] sm:$0xff]  ;;  %v325_v16 = vld [vmem:[%s1849_s20 + $0x210] sm:$0xff] }
  0x43   : > { %1056 = vst [vmem:[%s1892_s1 + $0x88] sm:$0xff] %v800_v8  ;;  %v820_v8 = vadd.f32 %v1867_v7, %v558_v57  ;;  %v568_v27 = vmul.f32 %v1865_v6, %v306_v19  ;;  %v569_v30 = vmul.f32 %v1860_v3, %v307_v22  ;;  %v570_v33 = vmul.f32 %v1865_v6, %v308_v25  ;;  %v326_v19 = vld [vmem:[%s1849_s20 + $0x218] sm:$0xff]  ;;  %v327_v22 = vld [vmem:[%s1849_s20 + $0x220] sm:$0xff]  ;;  %v328_v25 = vld [vmem:[%s1849_s20 + $0x228] sm:$0xff] }
  0x44   : > { %1057 = vst [vmem:[%s1892_s1 + $0x90] sm:$0xff] %v801_v11  ;;  %v821_v11 = vadd.f32 %v1862_v4, %v559_v60  ;;  %v571_v36 = vmul.f32 %v1860_v3, %v309_v28  ;;  %v572_v39 = vmul.f32 %v1865_v6, %v310_v31  ;;  %v573_v42 = vmul.f32 %v1860_v3, %v311_v34  ;;  %v329_v28 = vld [vmem:[%s1849_s20 + $0x230] sm:$0xff]  ;;  %v330_v31 = vld [vmem:[%s1849_s20 + $0x238] sm:$0xff]  ;;  %v331_v34 = vld [vmem:[%s1849_s20 + $0x240] sm:$0xff] }
  0x45   : > { %1058 = vst [vmem:[%s1892_s1 + $0x98] sm:$0xff] %v802_v14  ;;  %v822_v14 = vadd.f32 %v1867_v7, %v560_v63  ;;  %v574_v45 = vmul.f32 %v1865_v6, %v312_v37  ;;  %v575_v48 = vmul.f32 %v1860_v3, %v313_v40  ;;  %v576_v51 = vmul.f32 %v1865_v6, %v314_v43  ;;  %v332_v37 = vld [vmem:[%s1849_s20 + $0x248] sm:$0xff]  ;;  %v333_v40 = vld [vmem:[%s1849_s20 + $0x250] sm:$0xff]  ;;  %v334_v43 = vld [vmem:[%s1849_s20 + $0x258] sm:$0xff] }
  0x46   : > { %1059 = vst [vmem:[%s1892_s1 + $0xa0] sm:$0xff] %v803_v17  ;;  %v823_v17 = vadd.f32 %v1862_v4, %v561_v2  ;;  %v577_v54 = vmul.f32 %v1860_v3, %v315_v46  ;;  %v578_v57 = vmul.f32 %v1865_v6, %v316_v49  ;;  %v579_v60 = vmul.f32 %v1860_v3, %v317_v52  ;;  %v335_v46 = vld [vmem:[%s1849_s20 + $0x260] sm:$0xff]  ;;  %v336_v49 = vld [vmem:[%s1849_s20 + $0x268] sm:$0xff]  ;;  %v337_v52 = vld [vmem:[%s1849_s20 + $0x270] sm:$0xff] }
  0x47   : > { %1060 = vst [vmem:[%s1892_s1 + $0xa8] sm:$0xff] %v804_v20  ;;  %v824_v20 = vadd.f32 %v1867_v7, %v562_v9  ;;  %v580_v63 = vmul.f32 %v1865_v6, %v318_v55  ;;  %v581_v2 = vmul.f32 %v1860_v3, %v319_v58  ;;  %v582_v9 = vmul.f32 %v1865_v6, %v320_v61  ;;  %v338_v55 = vld [vmem:[%s1849_s20 + $0x278] sm:$0xff]  ;;  %v339_v58 = vld [vmem:[%s1849_s20 + $0x280] sm:$0xff]  ;;  %v340_v61 = vld [vmem:[%s1849_s20 + $0x288] sm:$0xff] }
  0x48   : > { %1061 = vst [vmem:[%s1892_s1 + $0xb0] sm:$0xff] %v805_v23  ;;  %v825_v23 = vadd.f32 %v1862_v4, %v563_v12  ;;  %v583_v12 = vmul.f32 %v1860_v3, %v321_v0  ;;  %v341_v0 = vld [vmem:[%s1849_s20 + $0x290] sm:$0xff] }
  0x49   : > { %1062 = vst [vmem:[%s1892_s1 + $0xb8] sm:$0xff] %v806_v26  ;;  %v826_v26 = vadd.f32 %v1867_v7, %v564_v15  ;;  %v584_v15 = vmul.f32 %v1865_v6, %v322_v5  ;;  %v342_v5 = vld [vmem:[%s1849_s20 + $0x298] sm:$0xff] }
  0x4a   : > { %1063 = vst [vmem:[%s1892_s1 + $0xc0] sm:$0xff] %v807_v29  ;;  %v827_v29 = vadd.f32 %v1862_v4, %v565_v18  ;;  %v585_v18 = vmul.f32 %v1860_v3, %v323_v10  ;;  %v343_v10 = vld [vmem:[%s1849_s20 + $0x2a0] sm:$0xff] }
  0x4b   : > { %1064 = vst [vmem:[%s1892_s1 + $0xc8] sm:$0xff] %v808_v32  ;;  %v828_v32 = vadd.f32 %v1867_v7, %v566_v21  ;;  %v586_v21 = vmul.f32 %v1865_v6, %v324_v13  ;;  %v344_v13 = vld [vmem:[%s1849_s20 + $0x2a8] sm:$0xff] }
  0x4c   : > { %1065 = vst [vmem:[%s1892_s1 + $0xd0] sm:$0xff] %v809_v35  ;;  %v829_v35 = vadd.f32 %v1862_v4, %v567_v24  ;;  %v587_v24 = vmul.f32 %v1860_v3, %v325_v16  ;;  %v345_v16 = vld [vmem:[%s1849_s20 + $0x2b0] sm:$0xff] }
  0x4d   : > { %1066 = vst [vmem:[%s1892_s1 + $0xd8] sm:$0xff] %v810_v38  ;;  %v830_v38 = vadd.f32 %v1867_v7, %v568_v27  ;;  %v588_v27 = vmul.f32 %v1865_v6, %v326_v19  ;;  %v346_v19 = vld [vmem:[%s1849_s20 + $0x2b8] sm:$0xff] }
  0x4e   : > { %1067 = vst [vmem:[%s1892_s1 + $0xe0] sm:$0xff] %v811_v41  ;;  %v831_v41 = vadd.f32 %v1862_v4, %v569_v30  ;;  %v589_v30 = vmul.f32 %v1860_v3, %v327_v22  ;;  %v347_v22 = vld [vmem:[%s1849_s20 + $0x2c0] sm:$0xff] }
  0x4f   : > { %1068 = vst [vmem:[%s1892_s1 + $0xe8] sm:$0xff] %v812_v44  ;;  %v832_v44 = vadd.f32 %v1867_v7, %v570_v33  ;;  %v590_v33 = vmul.f32 %v1865_v6, %v328_v25  ;;  %v348_v25 = vld [vmem:[%s1849_s20 + $0x2c8] sm:$0xff] }
  0x50   : > { %1069 = vst [vmem:[%s1892_s1 + $0xf0] sm:$0xff] %v813_v47  ;;  %v833_v47 = vadd.f32 %v1862_v4, %v571_v36  ;;  %v591_v36 = vmul.f32 %v1860_v3, %v329_v28  ;;  %v349_v28 = vld [vmem:[%s1849_s20 + $0x2d0] sm:$0xff] }
  0x51   : > { %1070 = vst [vmem:[%s1892_s1 + $0xf8] sm:$0xff] %v814_v50  ;;  %v834_v50 = vadd.f32 %v1867_v7, %v572_v39  ;;  %v592_v39 = vmul.f32 %v1865_v6, %v330_v31  ;;  %v350_v31 = vld [vmem:[%s1849_s20 + $0x2d8] sm:$0xff] }
  0x52   : > { %1071 = vst [vmem:[%s1892_s1 + $0x100] sm:$0xff] %v815_v53  ;;  %v835_v53 = vadd.f32 %v1862_v4, %v573_v42  ;;  %v593_v42 = vmul.f32 %v1860_v3, %v331_v34  ;;  %v351_v34 = vld [vmem:[%s1849_s20 + $0x2e0] sm:$0xff] }
  0x53   : > { %1072 = vst [vmem:[%s1892_s1 + $0x108] sm:$0xff] %v816_v56  ;;  %v836_v56 = vadd.f32 %v1867_v7, %v574_v45  ;;  %v594_v45 = vmul.f32 %v1865_v6, %v332_v37  ;;  %v352_v37 = vld [vmem:[%s1849_s20 + $0x2e8] sm:$0xff] }
  0x54   : > { %1073 = vst [vmem:[%s1892_s1 + $0x110] sm:$0xff] %v817_v59  ;;  %v837_v59 = vadd.f32 %v1862_v4, %v575_v48  ;;  %v595_v48 = vmul.f32 %v1860_v3, %v333_v40  ;;  %v353_v40 = vld [vmem:[%s1849_s20 + $0x2f0] sm:$0xff] }
  0x55   : > { %1074 = vst [vmem:[%s1892_s1 + $0x118] sm:$0xff] %v818_v62  ;;  %v838_v62 = vadd.f32 %v1867_v7, %v576_v51  ;;  %v596_v51 = vmul.f32 %v1865_v6, %v334_v43  ;;  %v354_v43 = vld [vmem:[%s1849_s20 + $0x2f8] sm:$0xff] }
  0x56   : > { %1075 = vst [vmem:[%s1892_s1 + $0x120] sm:$0xff] %v819_v1  ;;  %v839_v1 = vadd.f32 %v1862_v4, %v577_v54  ;;  %v597_v54 = vmul.f32 %v1860_v3, %v335_v46  ;;  %v355_v46 = vld [vmem:[%s1849_s20 + $0x300] sm:$0xff] }
  0x57   : > { %1076 = vst [vmem:[%s1892_s1 + $0x128] sm:$0xff] %v820_v8  ;;  %v840_v8 = vadd.f32 %v1867_v7, %v578_v57  ;;  %v598_v57 = vmul.f32 %v1865_v6, %v336_v49  ;;  %v356_v49 = vld [vmem:[%s1849_s20 + $0x308] sm:$0xff] }
  0x58   : > { %1077 = vst [vmem:[%s1892_s1 + $0x130] sm:$0xff] %v821_v11  ;;  %v841_v11 = vadd.f32 %v1862_v4, %v579_v60  ;;  %v599_v60 = vmul.f32 %v1860_v3, %v337_v52  ;;  %v357_v52 = vld [vmem:[%s1849_s20 + $0x310] sm:$0xff] }
  0x59   : > { %1078 = vst [vmem:[%s1892_s1 + $0x138] sm:$0xff] %v822_v14  ;;  %v842_v14 = vadd.f32 %v1867_v7, %v580_v63  ;;  %v600_v63 = vmul.f32 %v1865_v6, %v338_v55  ;;  %v358_v55 = vld [vmem:[%s1849_s20 + $0x318] sm:$0xff] }
  0x5a   : > { %1079 = vst [vmem:[%s1892_s1 + $0x140] sm:$0xff] %v823_v17  ;;  %v843_v17 = vadd.f32 %v1862_v4, %v581_v2  ;;  %v601_v2 = vmul.f32 %v1860_v3, %v339_v58  ;;  %v359_v58 = vld [vmem:[%s1849_s20 + $0x320] sm:$0xff] }
  0x5b   : > { %1080 = vst [vmem:[%s1892_s1 + $0x148] sm:$0xff] %v824_v20  ;;  %v844_v20 = vadd.f32 %v1867_v7, %v582_v9  ;;  %v602_v9 = vmul.f32 %v1865_v6, %v340_v61  ;;  %v360_v61 = vld [vmem:[%s1849_s20 + $0x328] sm:$0xff] }
  0x5c   : > { %1081 = vst [vmem:[%s1892_s1 + $0x150] sm:$0xff] %v825_v23  ;;  %v845_v23 = vadd.f32 %v1862_v4, %v583_v12  ;;  %v603_v12 = vmul.f32 %v1860_v3, %v341_v0  ;;  %v361_v0 = vld [vmem:[%s1849_s20 + $0x330] sm:$0xff] }
  0x5d   : > { %1082 = vst [vmem:[%s1892_s1 + $0x158] sm:$0xff] %v826_v26  ;;  %v846_v26 = vadd.f32 %v1867_v7, %v584_v15  ;;  %v604_v15 = vmul.f32 %v1865_v6, %v342_v5  ;;  %v362_v5 = vld [vmem:[%s1849_s20 + $0x338] sm:$0xff] }
  0x5e   : > { %1083 = vst [vmem:[%s1892_s1 + $0x160] sm:$0xff] %v827_v29  ;;  %v847_v29 = vadd.f32 %v1862_v4, %v585_v18  ;;  %v605_v18 = vmul.f32 %v1860_v3, %v343_v10  ;;  %v363_v10 = vld [vmem:[%s1849_s20 + $0x340] sm:$0xff] }
  0x5f   : > { %1084 = vst [vmem:[%s1892_s1 + $0x168] sm:$0xff] %v828_v32  ;;  %v848_v32 = vadd.f32 %v1867_v7, %v586_v21  ;;  %v606_v21 = vmul.f32 %v1865_v6, %v344_v13  ;;  %v364_v13 = vld [vmem:[%s1849_s20 + $0x348] sm:$0xff] }
  0x60   : > { %1085 = vst [vmem:[%s1892_s1 + $0x170] sm:$0xff] %v829_v35  ;;  %v849_v35 = vadd.f32 %v1862_v4, %v587_v24  ;;  %v607_v24 = vmul.f32 %v1860_v3, %v345_v16  ;;  %v365_v16 = vld [vmem:[%s1849_s20 + $0x350] sm:$0xff] }
  0x61   : > { %1086 = vst [vmem:[%s1892_s1 + $0x178] sm:$0xff] %v830_v38  ;;  %v850_v38 = vadd.f32 %v1867_v7, %v588_v27  ;;  %v608_v27 = vmul.f32 %v1865_v6, %v346_v19  ;;  %v366_v19 = vld [vmem:[%s1849_s20 + $0x358] sm:$0xff] }
  0x62   : > { %1087 = vst [vmem:[%s1892_s1 + $0x180] sm:$0xff] %v831_v41  ;;  %v851_v41 = vadd.f32 %v1862_v4, %v589_v30  ;;  %v609_v30 = vmul.f32 %v1860_v3, %v347_v22  ;;  %v367_v22 = vld [vmem:[%s1849_s20 + $0x360] sm:$0xff] }
  0x63   : > { %1088 = vst [vmem:[%s1892_s1 + $0x188] sm:$0xff] %v832_v44  ;;  %v852_v44 = vadd.f32 %v1867_v7, %v590_v33  ;;  %v610_v33 = vmul.f32 %v1865_v6, %v348_v25  ;;  %v368_v25 = vld [vmem:[%s1849_s20 + $0x368] sm:$0xff] }
  0x64   : > { %1089 = vst [vmem:[%s1892_s1 + $0x190] sm:$0xff] %v833_v47  ;;  %v853_v47 = vadd.f32 %v1862_v4, %v591_v36  ;;  %v611_v36 = vmul.f32 %v1860_v3, %v349_v28  ;;  %v369_v28 = vld [vmem:[%s1849_s20 + $0x370] sm:$0xff] }
  0x65   : > { %1090 = vst [vmem:[%s1892_s1 + $0x198] sm:$0xff] %v834_v50  ;;  %v854_v50 = vadd.f32 %v1867_v7, %v592_v39  ;;  %v612_v39 = vmul.f32 %v1865_v6, %v350_v31  ;;  %v370_v31 = vld [vmem:[%s1849_s20 + $0x378] sm:$0xff] }
  0x66   : > { %1091 = vst [vmem:[%s1892_s1 + $0x1a0] sm:$0xff] %v835_v53  ;;  %v855_v53 = vadd.f32 %v1862_v4, %v593_v42  ;;  %v613_v42 = vmul.f32 %v1860_v3, %v351_v34  ;;  %v371_v34 = vld [vmem:[%s1849_s20 + $0x380] sm:$0xff] }
  0x67   : > { %1092 = vst [vmem:[%s1892_s1 + $0x1a8] sm:$0xff] %v836_v56  ;;  %v856_v56 = vadd.f32 %v1867_v7, %v594_v45  ;;  %v614_v45 = vmul.f32 %v1865_v6, %v352_v37  ;;  %v372_v37 = vld [vmem:[%s1849_s20 + $0x388] sm:$0xff] }
  0x68   : > { %1093 = vst [vmem:[%s1892_s1 + $0x1b0] sm:$0xff] %v837_v59  ;;  %v857_v59 = vadd.f32 %v1862_v4, %v595_v48  ;;  %v615_v48 = vmul.f32 %v1860_v3, %v353_v40  ;;  %v373_v40 = vld [vmem:[%s1849_s20 + $0x390] sm:$0xff] }
  0x69   : > { %1094 = vst [vmem:[%s1892_s1 + $0x1b8] sm:$0xff] %v838_v62  ;;  %v858_v62 = vadd.f32 %v1867_v7, %v596_v51  ;;  %v616_v51 = vmul.f32 %v1865_v6, %v354_v43  ;;  %v374_v43 = vld [vmem:[%s1849_s20 + $0x398] sm:$0xff] }
  0x6a   : > { %1095 = vst [vmem:[%s1892_s1 + $0x1c0] sm:$0xff] %v839_v1  ;;  %v859_v1 = vadd.f32 %v1862_v4, %v597_v54  ;;  %v617_v54 = vmul.f32 %v1860_v3, %v355_v46  ;;  %v375_v46 = vld [vmem:[%s1849_s20 + $0x3a0] sm:$0xff] }
  0x6b   : > { %1096 = vst [vmem:[%s1892_s1 + $0x1c8] sm:$0xff] %v840_v8  ;;  %v860_v8 = vadd.f32 %v1867_v7, %v598_v57  ;;  %v618_v57 = vmul.f32 %v1865_v6, %v356_v49  ;;  %v376_v49 = vld [vmem:[%s1849_s20 + $0x3a8] sm:$0xff] }
  0x6c   : > { %1097 = vst [vmem:[%s1892_s1 + $0x1d0] sm:$0xff] %v841_v11  ;;  %v861_v11 = vadd.f32 %v1862_v4, %v599_v60  ;;  %v619_v60 = vmul.f32 %v1860_v3, %v357_v52  ;;  %v377_v52 = vld [vmem:[%s1849_s20 + $0x3b0] sm:$0xff] }
  0x6d   : > { %1098 = vst [vmem:[%s1892_s1 + $0x1d8] sm:$0xff] %v842_v14  ;;  %v862_v14 = vadd.f32 %v1867_v7, %v600_v63  ;;  %v620_v63 = vmul.f32 %v1865_v6, %v358_v55  ;;  %v378_v55 = vld [vmem:[%s1849_s20 + $0x3b8] sm:$0xff] }
  0x6e   : > { %1099 = vst [vmem:[%s1892_s1 + $0x1e0] sm:$0xff] %v843_v17  ;;  %v863_v17 = vadd.f32 %v1862_v4, %v601_v2  ;;  %v621_v2 = vmul.f32 %v1860_v3, %v359_v58  ;;  %v379_v58 = vld [vmem:[%s1849_s20 + $0x3c0] sm:$0xff] }
  0x6f   : > { %1100 = vst [vmem:[%s1892_s1 + $0x1e8] sm:$0xff] %v844_v20  ;;  %v864_v20 = vadd.f32 %v1867_v7, %v602_v9  ;;  %v622_v9 = vmul.f32 %v1865_v6, %v360_v61  ;;  %v380_v61 = vld [vmem:[%s1849_s20 + $0x3c8] sm:$0xff] }
  0x70   : > { %1101 = vst [vmem:[%s1892_s1 + $0x1f0] sm:$0xff] %v845_v23  ;;  %v865_v23 = vadd.f32 %v1862_v4, %v603_v12  ;;  %v623_v12 = vmul.f32 %v1860_v3, %v361_v0  ;;  %v381_v0 = vld [vmem:[%s1849_s20 + $0x3d0] sm:$0xff] }
  0x71   : > { %1102 = vst [vmem:[%s1892_s1 + $0x1f8] sm:$0xff] %v846_v26  ;;  %v866_v26 = vadd.f32 %v1867_v7, %v604_v15  ;;  %v624_v15 = vmul.f32 %v1865_v6, %v362_v5  ;;  %v382_v5 = vld [vmem:[%s1849_s20 + $0x3d8] sm:$0xff] }
  0x72   : > { %1103 = vst [vmem:[%s1892_s1 + $0x200] sm:$0xff] %v847_v29  ;;  %v867_v29 = vadd.f32 %v1862_v4, %v605_v18  ;;  %v625_v18 = vmul.f32 %v1860_v3, %v363_v10  ;;  %v383_v10 = vld [vmem:[%s1849_s20 + $0x3e0] sm:$0xff] }
  0x73   : > { %1104 = vst [vmem:[%s1892_s1 + $0x208] sm:$0xff] %v848_v32  ;;  %v868_v32 = vadd.f32 %v1867_v7, %v606_v21  ;;  %v626_v21 = vmul.f32 %v1865_v6, %v364_v13  ;;  %v384_v13 = vld [vmem:[%s1849_s20 + $0x3e8] sm:$0xff] }
  0x74   : > { %1105 = vst [vmem:[%s1892_s1 + $0x210] sm:$0xff] %v849_v35  ;;  %v869_v35 = vadd.f32 %v1862_v4, %v607_v24  ;;  %v627_v24 = vmul.f32 %v1860_v3, %v365_v16  ;;  %v385_v16 = vld [vmem:[%s1849_s20 + $0x3f0] sm:$0xff] }
  0x75   : > { %1106 = vst [vmem:[%s1892_s1 + $0x218] sm:$0xff] %v850_v38  ;;  %v870_v38 = vadd.f32 %v1867_v7, %v608_v27  ;;  %v628_v27 = vmul.f32 %v1865_v6, %v366_v19  ;;  %v386_v19 = vld [vmem:[%s1849_s20 + $0x3f8] sm:$0xff] }
  0x76   : > { %1107 = vst [vmem:[%s1892_s1 + $0x220] sm:$0xff] %v851_v41  ;;  %v871_v41 = vadd.f32 %v1862_v4, %v609_v30  ;;  %v629_v30 = vmul.f32 %v1860_v3, %v367_v22  ;;  %v387_v22 = vld [vmem:[%s1849_s20 + $0x400] sm:$0xff] }
  0x77   : > { %1108 = vst [vmem:[%s1892_s1 + $0x228] sm:$0xff] %v852_v44  ;;  %v872_v44 = vadd.f32 %v1867_v7, %v610_v33  ;;  %v630_v33 = vmul.f32 %v1865_v6, %v368_v25  ;;  %v388_v25 = vld [vmem:[%s1849_s20 + $0x408] sm:$0xff] }
  0x78   : > { %1109 = vst [vmem:[%s1892_s1 + $0x230] sm:$0xff] %v853_v47  ;;  %v873_v47 = vadd.f32 %v1862_v4, %v611_v36  ;;  %v631_v36 = vmul.f32 %v1860_v3, %v369_v28  ;;  %v389_v28 = vld [vmem:[%s1849_s20 + $0x410] sm:$0xff] }
  0x79   : > { %1110 = vst [vmem:[%s1892_s1 + $0x238] sm:$0xff] %v854_v50  ;;  %v874_v50 = vadd.f32 %v1867_v7, %v612_v39  ;;  %v632_v39 = vmul.f32 %v1865_v6, %v370_v31  ;;  %v390_v31 = vld [vmem:[%s1849_s20 + $0x418] sm:$0xff] }
  0x7a   : > { %1111 = vst [vmem:[%s1892_s1 + $0x240] sm:$0xff] %v855_v53  ;;  %v875_v53 = vadd.f32 %v1862_v4, %v613_v42  ;;  %v633_v42 = vmul.f32 %v1860_v3, %v371_v34  ;;  %v391_v34 = vld [vmem:[%s1849_s20 + $0x420] sm:$0xff] }
  0x7b   : > { %1112 = vst [vmem:[%s1892_s1 + $0x248] sm:$0xff] %v856_v56  ;;  %v876_v56 = vadd.f32 %v1867_v7, %v614_v45  ;;  %v634_v45 = vmul.f32 %v1865_v6, %v372_v37  ;;  %v392_v37 = vld [vmem:[%s1849_s20 + $0x428] sm:$0xff] }
  0x7c   : > { %1113 = vst [vmem:[%s1892_s1 + $0x250] sm:$0xff] %v857_v59  ;;  %v877_v59 = vadd.f32 %v1862_v4, %v615_v48  ;;  %v635_v48 = vmul.f32 %v1860_v3, %v373_v40  ;;  %v393_v40 = vld [vmem:[%s1849_s20 + $0x430] sm:$0xff] }
  0x7d   : > { %1114 = vst [vmem:[%s1892_s1 + $0x258] sm:$0xff] %v858_v62  ;;  %v878_v62 = vadd.f32 %v1867_v7, %v616_v51  ;;  %v636_v51 = vmul.f32 %v1865_v6, %v374_v43  ;;  %v394_v43 = vld [vmem:[%s1849_s20 + $0x438] sm:$0xff] }
  0x7e   : > { %1115 = vst [vmem:[%s1892_s1 + $0x260] sm:$0xff] %v859_v1  ;;  %v879_v1 = vadd.f32 %v1862_v4, %v617_v54  ;;  %v637_v54 = vmul.f32 %v1860_v3, %v375_v46  ;;  %v395_v46 = vld [vmem:[%s1849_s20 + $0x440] sm:$0xff] }
  0x7f   : > { %1116 = vst [vmem:[%s1892_s1 + $0x268] sm:$0xff] %v860_v8  ;;  %v880_v8 = vadd.f32 %v1867_v7, %v618_v57  ;;  %v638_v57 = vmul.f32 %v1865_v6, %v376_v49  ;;  %v396_v49 = vld [vmem:[%s1849_s20 + $0x448] sm:$0xff] }
  0x80   : > { %1117 = vst [vmem:[%s1892_s1 + $0x270] sm:$0xff] %v861_v11  ;;  %v881_v11 = vadd.f32 %v1862_v4, %v619_v60  ;;  %v639_v60 = vmul.f32 %v1860_v3, %v377_v52  ;;  %v397_v52 = vld [vmem:[%s1849_s20 + $0x450] sm:$0xff] }
  0x81   : > { %1118 = vst [vmem:[%s1892_s1 + $0x278] sm:$0xff] %v862_v14  ;;  %v882_v14 = vadd.f32 %v1867_v7, %v620_v63  ;;  %v640_v63 = vmul.f32 %v1865_v6, %v378_v55  ;;  %v398_v55 = vld [vmem:[%s1849_s20 + $0x458] sm:$0xff] }
  0x82   : > { %1119 = vst [vmem:[%s1892_s1 + $0x280] sm:$0xff] %v863_v17  ;;  %v883_v17 = vadd.f32 %v1862_v4, %v621_v2  ;;  %v641_v2 = vmul.f32 %v1860_v3, %v379_v58  ;;  %v399_v58 = vld [vmem:[%s1849_s20 + $0x460] sm:$0xff] }
  0x83   : > { %1120 = vst [vmem:[%s1892_s1 + $0x288] sm:$0xff] %v864_v20  ;;  %v884_v20 = vadd.f32 %v1867_v7, %v622_v9  ;;  %v642_v9 = vmul.f32 %v1865_v6, %v380_v61  ;;  %v400_v61 = vld [vmem:[%s1849_s20 + $0x468] sm:$0xff] }
  0x84   : > { %1121 = vst [vmem:[%s1892_s1 + $0x290] sm:$0xff] %v865_v23  ;;  %v885_v23 = vadd.f32 %v1862_v4, %v623_v12  ;;  %v643_v12 = vmul.f32 %v1860_v3, %v381_v0  ;;  %v401_v0 = vld [vmem:[%s1849_s20 + $0x470] sm:$0xff] }
  0x85   : > { %1122 = vst [vmem:[%s1892_s1 + $0x298] sm:$0xff] %v866_v26  ;;  %v886_v26 = vadd.f32 %v1867_v7, %v624_v15  ;;  %v644_v15 = vmul.f32 %v1865_v6, %v382_v5  ;;  %v402_v5 = vld [vmem:[%s1849_s20 + $0x478] sm:$0xff] }
  0x86   : > { %1123 = vst [vmem:[%s1892_s1 + $0x2a0] sm:$0xff] %v867_v29  ;;  %v887_v29 = vadd.f32 %v1862_v4, %v625_v18  ;;  %v645_v18 = vmul.f32 %v1860_v3, %v383_v10  ;;  %v403_v10 = vld [vmem:[%s1849_s20 + $0x480] sm:$0xff] }
  0x87   : > { %1124 = vst [vmem:[%s1892_s1 + $0x2a8] sm:$0xff] %v868_v32  ;;  %v888_v32 = vadd.f32 %v1867_v7, %v626_v21  ;;  %v646_v21 = vmul.f32 %v1865_v6, %v384_v13  ;;  %v404_v13 = vld [vmem:[%s1849_s20 + $0x488] sm:$0xff] }
  0x88   : > { %1125 = vst [vmem:[%s1892_s1 + $0x2b0] sm:$0xff] %v869_v35  ;;  %v889_v35 = vadd.f32 %v1862_v4, %v627_v24  ;;  %v647_v24 = vmul.f32 %v1860_v3, %v385_v16  ;;  %v405_v16 = vld [vmem:[%s1849_s20 + $0x490] sm:$0xff] }
  0x89   : > { %1126 = vst [vmem:[%s1892_s1 + $0x2b8] sm:$0xff] %v870_v38  ;;  %v890_v38 = vadd.f32 %v1867_v7, %v628_v27  ;;  %v648_v27 = vmul.f32 %v1865_v6, %v386_v19  ;;  %v406_v19 = vld [vmem:[%s1849_s20 + $0x498] sm:$0xff] }
  0x8a   : > { %1127 = vst [vmem:[%s1892_s1 + $0x2c0] sm:$0xff] %v871_v41  ;;  %v891_v41 = vadd.f32 %v1862_v4, %v629_v30  ;;  %v649_v30 = vmul.f32 %v1860_v3, %v387_v22  ;;  %v407_v22 = vld [vmem:[%s1849_s20 + $0x4a0] sm:$0xff] }
  0x8b   : > { %1128 = vst [vmem:[%s1892_s1 + $0x2c8] sm:$0xff] %v872_v44  ;;  %v892_v44 = vadd.f32 %v1867_v7, %v630_v33  ;;  %v650_v33 = vmul.f32 %v1865_v6, %v388_v25  ;;  %v408_v25 = vld [vmem:[%s1849_s20 + $0x4a8] sm:$0xff] }
  0x8c   : > { %1129 = vst [vmem:[%s1892_s1 + $0x2d0] sm:$0xff] %v873_v47  ;;  %v893_v47 = vadd.f32 %v1862_v4, %v631_v36  ;;  %v651_v36 = vmul.f32 %v1860_v3, %v389_v28  ;;  %v409_v28 = vld [vmem:[%s1849_s20 + $0x4b0] sm:$0xff] }
  0x8d   : > { %1130 = vst [vmem:[%s1892_s1 + $0x2d8] sm:$0xff] %v874_v50  ;;  %v894_v50 = vadd.f32 %v1867_v7, %v632_v39  ;;  %v652_v39 = vmul.f32 %v1865_v6, %v390_v31  ;;  %v410_v31 = vld [vmem:[%s1849_s20 + $0x4b8] sm:$0xff] }
  0x8e   : > { %1131 = vst [vmem:[%s1892_s1 + $0x2e0] sm:$0xff] %v875_v53  ;;  %v895_v53 = vadd.f32 %v1862_v4, %v633_v42  ;;  %v653_v42 = vmul.f32 %v1860_v3, %v391_v34  ;;  %v411_v34 = vld [vmem:[%s1849_s20 + $0x4c0] sm:$0xff] }
  0x8f   : > { %1132 = vst [vmem:[%s1892_s1 + $0x2e8] sm:$0xff] %v876_v56  ;;  %v896_v56 = vadd.f32 %v1867_v7, %v634_v45  ;;  %v654_v45 = vmul.f32 %v1865_v6, %v392_v37  ;;  %v412_v37 = vld [vmem:[%s1849_s20 + $0x4c8] sm:$0xff] }
  0x90   : > { %1133 = vst [vmem:[%s1892_s1 + $0x2f0] sm:$0xff] %v877_v59  ;;  %v897_v59 = vadd.f32 %v1862_v4, %v635_v48  ;;  %v655_v48 = vmul.f32 %v1860_v3, %v393_v40  ;;  %v413_v40 = vld [vmem:[%s1849_s20 + $0x4d0] sm:$0xff] }
  0x91   : > { %1134 = vst [vmem:[%s1892_s1 + $0x2f8] sm:$0xff] %v878_v62  ;;  %v898_v62 = vadd.f32 %v1867_v7, %v636_v51  ;;  %v656_v51 = vmul.f32 %v1865_v6, %v394_v43  ;;  %v414_v43 = vld [vmem:[%s1849_s20 + $0x4d8] sm:$0xff] }
  0x92   : > { %1135 = vst [vmem:[%s1892_s1 + $0x300] sm:$0xff] %v879_v1  ;;  %v899_v1 = vadd.f32 %v1862_v4, %v637_v54  ;;  %v657_v54 = vmul.f32 %v1860_v3, %v395_v46  ;;  %v415_v46 = vld [vmem:[%s1849_s20 + $0x4e0] sm:$0xff] }
  0x93   : > { %1136 = vst [vmem:[%s1892_s1 + $0x308] sm:$0xff] %v880_v8  ;;  %v900_v8 = vadd.f32 %v1867_v7, %v638_v57  ;;  %v658_v57 = vmul.f32 %v1865_v6, %v396_v49  ;;  %v416_v49 = vld [vmem:[%s1849_s20 + $0x4e8] sm:$0xff] }
  0x94   : > { %1137 = vst [vmem:[%s1892_s1 + $0x310] sm:$0xff] %v881_v11  ;;  %v901_v11 = vadd.f32 %v1862_v4, %v639_v60  ;;  %v659_v60 = vmul.f32 %v1860_v3, %v397_v52  ;;  %v417_v52 = vld [vmem:[%s1849_s20 + $0x4f0] sm:$0xff] }
  0x95   : > { %1138 = vst [vmem:[%s1892_s1 + $0x318] sm:$0xff] %v882_v14  ;;  %v902_v14 = vadd.f32 %v1867_v7, %v640_v63  ;;  %v660_v63 = vmul.f32 %v1865_v6, %v398_v55  ;;  %v418_v55 = vld [vmem:[%s1849_s20 + $0x4f8] sm:$0xff] }
  0x96   : > { %1139 = vst [vmem:[%s1892_s1 + $0x320] sm:$0xff] %v883_v17  ;;  %v903_v17 = vadd.f32 %v1862_v4, %v641_v2  ;;  %v661_v2 = vmul.f32 %v1860_v3, %v399_v58  ;;  %v419_v58 = vld [vmem:[%s1849_s20 + $0x500] sm:$0xff] }
  0x97   : > { %1140 = vst [vmem:[%s1892_s1 + $0x328] sm:$0xff] %v884_v20  ;;  %v904_v20 = vadd.f32 %v1867_v7, %v642_v9  ;;  %v662_v9 = vmul.f32 %v1865_v6, %v400_v61  ;;  %v420_v61 = vld [vmem:[%s1849_s20 + $0x508] sm:$0xff] }
  0x98   : > { %1141 = vst [vmem:[%s1892_s1 + $0x330] sm:$0xff] %v885_v23  ;;  %v905_v23 = vadd.f32 %v1862_v4, %v643_v12  ;;  %v663_v12 = vmul.f32 %v1860_v3, %v401_v0  ;;  %v421_v0 = vld [vmem:[%s1849_s20 + $0x510] sm:$0xff] }
  0x99   : > { %1142 = vst [vmem:[%s1892_s1 + $0x338] sm:$0xff] %v886_v26  ;;  %v906_v26 = vadd.f32 %v1867_v7, %v644_v15  ;;  %v664_v15 = vmul.f32 %v1865_v6, %v402_v5  ;;  %v422_v5 = vld [vmem:[%s1849_s20 + $0x518] sm:$0xff] }
  0x9a   : > { %1143 = vst [vmem:[%s1892_s1 + $0x340] sm:$0xff] %v887_v29  ;;  %v907_v29 = vadd.f32 %v1862_v4, %v645_v18  ;;  %v665_v18 = vmul.f32 %v1860_v3, %v403_v10  ;;  %v423_v10 = vld [vmem:[%s1849_s20 + $0x520] sm:$0xff] }
  0x9b   : > { %1144 = vst [vmem:[%s1892_s1 + $0x348] sm:$0xff] %v888_v32  ;;  %v908_v32 = vadd.f32 %v1867_v7, %v646_v21  ;;  %v666_v21 = vmul.f32 %v1865_v6, %v404_v13  ;;  %v424_v13 = vld [vmem:[%s1849_s20 + $0x528] sm:$0xff] }
  0x9c   : > { %1145 = vst [vmem:[%s1892_s1 + $0x350] sm:$0xff] %v889_v35  ;;  %v909_v35 = vadd.f32 %v1862_v4, %v647_v24  ;;  %v667_v24 = vmul.f32 %v1860_v3, %v405_v16  ;;  %v425_v16 = vld [vmem:[%s1849_s20 + $0x530] sm:$0xff] }
  0x9d   : > { %1146 = vst [vmem:[%s1892_s1 + $0x358] sm:$0xff] %v890_v38  ;;  %v910_v38 = vadd.f32 %v1867_v7, %v648_v27  ;;  %v668_v27 = vmul.f32 %v1865_v6, %v406_v19  ;;  %v426_v19 = vld [vmem:[%s1849_s20 + $0x538] sm:$0xff] }
  0x9e   : > { %1147 = vst [vmem:[%s1892_s1 + $0x360] sm:$0xff] %v891_v41  ;;  %v911_v41 = vadd.f32 %v1862_v4, %v649_v30  ;;  %v669_v30 = vmul.f32 %v1860_v3, %v407_v22  ;;  %v427_v22 = vld [vmem:[%s1849_s20 + $0x540] sm:$0xff] }
  0x9f   : > { %1148 = vst [vmem:[%s1892_s1 + $0x368] sm:$0xff] %v892_v44  ;;  %v912_v44 = vadd.f32 %v1867_v7, %v650_v33  ;;  %v670_v33 = vmul.f32 %v1865_v6, %v408_v25  ;;  %v428_v25 = vld [vmem:[%s1849_s20 + $0x548] sm:$0xff] }
  0xa0   : > { %1149 = vst [vmem:[%s1892_s1 + $0x370] sm:$0xff] %v893_v47  ;;  %v913_v47 = vadd.f32 %v1862_v4, %v651_v36  ;;  %v671_v36 = vmul.f32 %v1860_v3, %v409_v28  ;;  %v429_v28 = vld [vmem:[%s1849_s20 + $0x550] sm:$0xff] }
  0xa1   : > { %1150 = vst [vmem:[%s1892_s1 + $0x378] sm:$0xff] %v894_v50  ;;  %v914_v50 = vadd.f32 %v1867_v7, %v652_v39  ;;  %v672_v39 = vmul.f32 %v1865_v6, %v410_v31  ;;  %v430_v31 = vld [vmem:[%s1849_s20 + $0x558] sm:$0xff] }
  0xa2   : > { %1151 = vst [vmem:[%s1892_s1 + $0x380] sm:$0xff] %v895_v53  ;;  %v915_v53 = vadd.f32 %v1862_v4, %v653_v42  ;;  %v673_v42 = vmul.f32 %v1860_v3, %v411_v34  ;;  %v431_v34 = vld [vmem:[%s1849_s20 + $0x560] sm:$0xff] }
  0xa3   : > { %1152 = vst [vmem:[%s1892_s1 + $0x388] sm:$0xff] %v896_v56  ;;  %v916_v56 = vadd.f32 %v1867_v7, %v654_v45  ;;  %v674_v45 = vmul.f32 %v1865_v6, %v412_v37  ;;  %v432_v37 = vld [vmem:[%s1849_s20 + $0x568] sm:$0xff] }
  0xa4   : > { %1153 = vst [vmem:[%s1892_s1 + $0x390] sm:$0xff] %v897_v59  ;;  %v917_v59 = vadd.f32 %v1862_v4, %v655_v48  ;;  %v675_v48 = vmul.f32 %v1860_v3, %v413_v40  ;;  %v433_v40 = vld [vmem:[%s1849_s20 + $0x570] sm:$0xff] }
  0xa5   : > { %1154 = vst [vmem:[%s1892_s1 + $0x398] sm:$0xff] %v898_v62  ;;  %v918_v62 = vadd.f32 %v1867_v7, %v656_v51  ;;  %v676_v51 = vmul.f32 %v1865_v6, %v414_v43  ;;  %v434_v43 = vld [vmem:[%s1849_s20 + $0x578] sm:$0xff] }
  0xa6   : > { %1155 = vst [vmem:[%s1892_s1 + $0x3a0] sm:$0xff] %v899_v1  ;;  %v919_v1 = vadd.f32 %v1862_v4, %v657_v54  ;;  %v677_v54 = vmul.f32 %v1860_v3, %v415_v46  ;;  %v435_v46 = vld [vmem:[%s1849_s20 + $0x580] sm:$0xff] }
  0xa7   : > { %1156 = vst [vmem:[%s1892_s1 + $0x3a8] sm:$0xff] %v900_v8  ;;  %v920_v8 = vadd.f32 %v1867_v7, %v658_v57  ;;  %v678_v57 = vmul.f32 %v1865_v6, %v416_v49  ;;  %v436_v49 = vld [vmem:[%s1849_s20 + $0x588] sm:$0xff] }
  0xa8   : > { %1157 = vst [vmem:[%s1892_s1 + $0x3b0] sm:$0xff] %v901_v11  ;;  %v921_v11 = vadd.f32 %v1862_v4, %v659_v60  ;;  %v679_v60 = vmul.f32 %v1860_v3, %v417_v52  ;;  %v437_v52 = vld [vmem:[%s1849_s20 + $0x590] sm:$0xff] }
  0xa9   : > { %1158 = vst [vmem:[%s1892_s1 + $0x3b8] sm:$0xff] %v902_v14  ;;  %v922_v14 = vadd.f32 %v1867_v7, %v660_v63  ;;  %v680_v63 = vmul.f32 %v1865_v6, %v418_v55  ;;  %v438_v55 = vld [vmem:[%s1849_s20 + $0x598] sm:$0xff] }
  0xaa   : > { %1159 = vst [vmem:[%s1892_s1 + $0x3c0] sm:$0xff] %v903_v17  ;;  %v923_v17 = vadd.f32 %v1862_v4, %v661_v2  ;;  %v681_v2 = vmul.f32 %v1860_v3, %v419_v58  ;;  %v439_v58 = vld [vmem:[%s1849_s20 + $0x5a0] sm:$0xff] }
  0xab   : > { %1160 = vst [vmem:[%s1892_s1 + $0x3c8] sm:$0xff] %v904_v20  ;;  %v924_v20 = vadd.f32 %v1867_v7, %v662_v9  ;;  %v682_v9 = vmul.f32 %v1865_v6, %v420_v61  ;;  %v440_v61 = vld [vmem:[%s1849_s20 + $0x5a8] sm:$0xff] }
  0xac   : > { %1161 = vst [vmem:[%s1892_s1 + $0x3d0] sm:$0xff] %v905_v23  ;;  %v925_v23 = vadd.f32 %v1862_v4, %v663_v12  ;;  %v683_v12 = vmul.f32 %v1860_v3, %v421_v0  ;;  %v441_v0 = vld [vmem:[%s1849_s20 + $0x5b0] sm:$0xff] }
  0xad   : > { %1162 = vst [vmem:[%s1892_s1 + $0x3d8] sm:$0xff] %v906_v26  ;;  %v926_v26 = vadd.f32 %v1867_v7, %v664_v15  ;;  %v684_v15 = vmul.f32 %v1865_v6, %v422_v5  ;;  %v442_v5 = vld [vmem:[%s1849_s20 + $0x5b8] sm:$0xff] }
  0xae   : > { %1163 = vst [vmem:[%s1892_s1 + $0x3e0] sm:$0xff] %v907_v29  ;;  %v927_v29 = vadd.f32 %v1862_v4, %v665_v18  ;;  %v685_v18 = vmul.f32 %v1860_v3, %v423_v10  ;;  %v443_v10 = vld [vmem:[%s1849_s20 + $0x5c0] sm:$0xff] }
  0xaf   : > { %1164 = vst [vmem:[%s1892_s1 + $0x3e8] sm:$0xff] %v908_v32  ;;  %v928_v32 = vadd.f32 %v1867_v7, %v666_v21  ;;  %v686_v21 = vmul.f32 %v1865_v6, %v424_v13  ;;  %v444_v13 = vld [vmem:[%s1849_s20 + $0x5c8] sm:$0xff] }
  0xb0   : > { %1165 = vst [vmem:[%s1892_s1 + $0x3f0] sm:$0xff] %v909_v35  ;;  %v929_v35 = vadd.f32 %v1862_v4, %v667_v24  ;;  %v687_v24 = vmul.f32 %v1860_v3, %v425_v16  ;;  %v445_v16 = vld [vmem:[%s1849_s20 + $0x5d0] sm:$0xff] }
  0xb1   : > { %1166 = vst [vmem:[%s1892_s1 + $0x3f8] sm:$0xff] %v910_v38  ;;  %v930_v38 = vadd.f32 %v1867_v7, %v668_v27  ;;  %v688_v27 = vmul.f32 %v1865_v6, %v426_v19  ;;  %v446_v19 = vld [vmem:[%s1849_s20 + $0x5d8] sm:$0xff] }
  0xb2   : > { %1167 = vst [vmem:[%s1892_s1 + $0x400] sm:$0xff] %v911_v41  ;;  %v931_v41 = vadd.f32 %v1862_v4, %v669_v30  ;;  %v689_v30 = vmul.f32 %v1860_v3, %v427_v22  ;;  %v447_v22 = vld [vmem:[%s1849_s20 + $0x5e0] sm:$0xff] }
  0xb3   : > { %1168 = vst [vmem:[%s1892_s1 + $0x408] sm:$0xff] %v912_v44  ;;  %v932_v44 = vadd.f32 %v1867_v7, %v670_v33  ;;  %v690_v33 = vmul.f32 %v1865_v6, %v428_v25  ;;  %v448_v25 = vld [vmem:[%s1849_s20 + $0x5e8] sm:$0xff] }
  0xb4   : > { %1169 = vst [vmem:[%s1892_s1 + $0x410] sm:$0xff] %v913_v47  ;;  %v933_v47 = vadd.f32 %v1862_v4, %v671_v36  ;;  %v691_v36 = vmul.f32 %v1860_v3, %v429_v28  ;;  %v449_v28 = vld [vmem:[%s1849_s20 + $0x5f0] sm:$0xff] }
  0xb5   : > { %1170 = vst [vmem:[%s1892_s1 + $0x418] sm:$0xff] %v914_v50  ;;  %v934_v50 = vadd.f32 %v1867_v7, %v672_v39  ;;  %v692_v39 = vmul.f32 %v1865_v6, %v430_v31  ;;  %v450_v31 = vld [vmem:[%s1849_s20 + $0x5f8] sm:$0xff] }
  0xb6   : > { %1171 = vst [vmem:[%s1892_s1 + $0x420] sm:$0xff] %v915_v53  ;;  %v935_v53 = vadd.f32 %v1862_v4, %v673_v42  ;;  %v693_v42 = vmul.f32 %v1860_v3, %v431_v34  ;;  %v451_v34 = vld [vmem:[%s1849_s20 + $0x600] sm:$0xff] }
  0xb7   : > { %1172 = vst [vmem:[%s1892_s1 + $0x428] sm:$0xff] %v916_v56  ;;  %v936_v56 = vadd.f32 %v1867_v7, %v674_v45  ;;  %v694_v45 = vmul.f32 %v1865_v6, %v432_v37  ;;  %v452_v37 = vld [vmem:[%s1849_s20 + $0x608] sm:$0xff] }
  0xb8   : > { %1173 = vst [vmem:[%s1892_s1 + $0x430] sm:$0xff] %v917_v59  ;;  %v937_v59 = vadd.f32 %v1862_v4, %v675_v48  ;;  %v695_v48 = vmul.f32 %v1860_v3, %v433_v40  ;;  %v453_v40 = vld [vmem:[%s1849_s20 + $0x610] sm:$0xff] }
  0xb9   : > { %1174 = vst [vmem:[%s1892_s1 + $0x438] sm:$0xff] %v918_v62  ;;  %v938_v62 = vadd.f32 %v1867_v7, %v676_v51  ;;  %v696_v51 = vmul.f32 %v1865_v6, %v434_v43  ;;  %v454_v43 = vld [vmem:[%s1849_s20 + $0x618] sm:$0xff] }
  0xba   : > { %1175 = vst [vmem:[%s1892_s1 + $0x440] sm:$0xff] %v919_v1  ;;  %v939_v1 = vadd.f32 %v1862_v4, %v677_v54  ;;  %v697_v54 = vmul.f32 %v1860_v3, %v435_v46  ;;  %v455_v46 = vld [vmem:[%s1849_s20 + $0x620] sm:$0xff] }
  0xbb   : > { %1176 = vst [vmem:[%s1892_s1 + $0x448] sm:$0xff] %v920_v8  ;;  %v940_v8 = vadd.f32 %v1867_v7, %v678_v57  ;;  %v698_v57 = vmul.f32 %v1865_v6, %v436_v49  ;;  %v456_v49 = vld [vmem:[%s1849_s20 + $0x628] sm:$0xff] }
  0xbc   : > { %1177 = vst [vmem:[%s1892_s1 + $0x450] sm:$0xff] %v921_v11  ;;  %v941_v11 = vadd.f32 %v1862_v4, %v679_v60  ;;  %v699_v60 = vmul.f32 %v1860_v3, %v437_v52  ;;  %v457_v52 = vld [vmem:[%s1849_s20 + $0x630] sm:$0xff] }
  0xbd   : > { %1178 = vst [vmem:[%s1892_s1 + $0x458] sm:$0xff] %v922_v14  ;;  %v942_v14 = vadd.f32 %v1867_v7, %v680_v63  ;;  %v700_v63 = vmul.f32 %v1865_v6, %v438_v55  ;;  %v458_v55 = vld [vmem:[%s1849_s20 + $0x638] sm:$0xff] }
  0xbe   : > { %1179 = vst [vmem:[%s1892_s1 + $0x460] sm:$0xff] %v923_v17  ;;  %v943_v17 = vadd.f32 %v1862_v4, %v681_v2  ;;  %v701_v2 = vmul.f32 %v1860_v3, %v439_v58  ;;  %v459_v58 = vld [vmem:[%s1849_s20 + $0x640] sm:$0xff] }
  0xbf   : > { %1180 = vst [vmem:[%s1892_s1 + $0x468] sm:$0xff] %v924_v20  ;;  %v944_v20 = vadd.f32 %v1867_v7, %v682_v9  ;;  %v702_v9 = vmul.f32 %v1865_v6, %v440_v61  ;;  %v460_v61 = vld [vmem:[%s1849_s20 + $0x648] sm:$0xff] }
  0xc0   : > { %1181 = vst [vmem:[%s1892_s1 + $0x470] sm:$0xff] %v925_v23  ;;  %v945_v23 = vadd.f32 %v1862_v4, %v683_v12  ;;  %v703_v12 = vmul.f32 %v1860_v3, %v441_v0  ;;  %v461_v0 = vld [vmem:[%s1849_s20 + $0x650] sm:$0xff] }
  0xc1   : > { %1182 = vst [vmem:[%s1892_s1 + $0x478] sm:$0xff] %v926_v26  ;;  %v946_v26 = vadd.f32 %v1867_v7, %v684_v15  ;;  %v704_v15 = vmul.f32 %v1865_v6, %v442_v5  ;;  %v462_v5 = vld [vmem:[%s1849_s20 + $0x658] sm:$0xff] }
  0xc2   : > { %1183 = vst [vmem:[%s1892_s1 + $0x480] sm:$0xff] %v927_v29  ;;  %v947_v29 = vadd.f32 %v1862_v4, %v685_v18  ;;  %v705_v18 = vmul.f32 %v1860_v3, %v443_v10  ;;  %v463_v10 = vld [vmem:[%s1849_s20 + $0x660] sm:$0xff] }
  0xc3   : > { %1184 = vst [vmem:[%s1892_s1 + $0x488] sm:$0xff] %v928_v32  ;;  %v948_v32 = vadd.f32 %v1867_v7, %v686_v21  ;;  %v706_v21 = vmul.f32 %v1865_v6, %v444_v13  ;;  %v464_v13 = vld [vmem:[%s1849_s20 + $0x668] sm:$0xff] }
  0xc4   : > { %1185 = vst [vmem:[%s1892_s1 + $0x490] sm:$0xff] %v929_v35  ;;  %v949_v35 = vadd.f32 %v1862_v4, %v687_v24  ;;  %v707_v24 = vmul.f32 %v1860_v3, %v445_v16  ;;  %v465_v16 = vld [vmem:[%s1849_s20 + $0x670] sm:$0xff] }
  0xc5   : > { %1186 = vst [vmem:[%s1892_s1 + $0x498] sm:$0xff] %v930_v38  ;;  %v950_v38 = vadd.f32 %v1867_v7, %v688_v27  ;;  %v708_v27 = vmul.f32 %v1865_v6, %v446_v19  ;;  %v466_v19 = vld [vmem:[%s1849_s20 + $0x678] sm:$0xff] }
  0xc6   : > { %1187 = vst [vmem:[%s1892_s1 + $0x4a0] sm:$0xff] %v931_v41  ;;  %v951_v41 = vadd.f32 %v1862_v4, %v689_v30  ;;  %v709_v30 = vmul.f32 %v1860_v3, %v447_v22  ;;  %v467_v22 = vld [vmem:[%s1849_s20 + $0x680] sm:$0xff] }
  0xc7   : > { %1188 = vst [vmem:[%s1892_s1 + $0x4a8] sm:$0xff] %v932_v44  ;;  %v952_v44 = vadd.f32 %v1867_v7, %v690_v33  ;;  %v710_v33 = vmul.f32 %v1865_v6, %v448_v25  ;;  %v468_v25 = vld [vmem:[%s1849_s20 + $0x688] sm:$0xff] }
  0xc8   : > { %1189 = vst [vmem:[%s1892_s1 + $0x4b0] sm:$0xff] %v933_v47  ;;  %v953_v47 = vadd.f32 %v1862_v4, %v691_v36  ;;  %v711_v36 = vmul.f32 %v1860_v3, %v449_v28  ;;  %v469_v28 = vld [vmem:[%s1849_s20 + $0x690] sm:$0xff] }
  0xc9   : > { %1190 = vst [vmem:[%s1892_s1 + $0x4b8] sm:$0xff] %v934_v50  ;;  %v954_v50 = vadd.f32 %v1867_v7, %v692_v39  ;;  %v712_v39 = vmul.f32 %v1865_v6, %v450_v31  ;;  %v470_v31 = vld [vmem:[%s1849_s20 + $0x698] sm:$0xff] }
  0xca   : > { %1191 = vst [vmem:[%s1892_s1 + $0x4c0] sm:$0xff] %v935_v53  ;;  %v955_v53 = vadd.f32 %v1862_v4, %v693_v42  ;;  %v713_v42 = vmul.f32 %v1860_v3, %v451_v34  ;;  %v471_v34 = vld [vmem:[%s1849_s20 + $0x6a0] sm:$0xff] }
  0xcb   : > { %1192 = vst [vmem:[%s1892_s1 + $0x4c8] sm:$0xff] %v936_v56  ;;  %v956_v56 = vadd.f32 %v1867_v7, %v694_v45  ;;  %v714_v45 = vmul.f32 %v1865_v6, %v452_v37  ;;  %v472_v37 = vld [vmem:[%s1849_s20 + $0x6a8] sm:$0xff] }
  0xcc   : > { %1193 = vst [vmem:[%s1892_s1 + $0x4d0] sm:$0xff] %v937_v59  ;;  %v957_v59 = vadd.f32 %v1862_v4, %v695_v48  ;;  %v715_v48 = vmul.f32 %v1860_v3, %v453_v40  ;;  %v473_v40 = vld [vmem:[%s1849_s20 + $0x6b0] sm:$0xff] }
  0xcd   : > { %1194 = vst [vmem:[%s1892_s1 + $0x4d8] sm:$0xff] %v938_v62  ;;  %v958_v62 = vadd.f32 %v1867_v7, %v696_v51  ;;  %v716_v51 = vmul.f32 %v1865_v6, %v454_v43  ;;  %v474_v43 = vld [vmem:[%s1849_s20 + $0x6b8] sm:$0xff] }
  0xce   : > { %1195 = vst [vmem:[%s1892_s1 + $0x4e0] sm:$0xff] %v939_v1  ;;  %v959_v1 = vadd.f32 %v1862_v4, %v697_v54  ;;  %v717_v54 = vmul.f32 %v1860_v3, %v455_v46  ;;  %v475_v46 = vld [vmem:[%s1849_s20 + $0x6c0] sm:$0xff] }
  0xcf   : > { %1196 = vst [vmem:[%s1892_s1 + $0x4e8] sm:$0xff] %v940_v8  ;;  %v960_v8 = vadd.f32 %v1867_v7, %v698_v57  ;;  %v718_v57 = vmul.f32 %v1865_v6, %v456_v49  ;;  %v476_v49 = vld [vmem:[%s1849_s20 + $0x6c8] sm:$0xff] }
  0xd0   : > { %1197 = vst [vmem:[%s1892_s1 + $0x4f0] sm:$0xff] %v941_v11  ;;  %v961_v11 = vadd.f32 %v1862_v4, %v699_v60  ;;  %v719_v60 = vmul.f32 %v1860_v3, %v457_v52  ;;  %v477_v52 = vld [vmem:[%s1849_s20 + $0x6d0] sm:$0xff] }
  0xd1   : > { %1198 = vst [vmem:[%s1892_s1 + $0x4f8] sm:$0xff] %v942_v14  ;;  %v962_v14 = vadd.f32 %v1867_v7, %v700_v63  ;;  %v720_v63 = vmul.f32 %v1865_v6, %v458_v55  ;;  %v478_v55 = vld [vmem:[%s1849_s20 + $0x6d8] sm:$0xff] }
  0xd2   : > { %1199 = vst [vmem:[%s1892_s1 + $0x500] sm:$0xff] %v943_v17  ;;  %v963_v17 = vadd.f32 %v1862_v4, %v701_v2  ;;  %v721_v2 = vmul.f32 %v1860_v3, %v459_v58  ;;  %v479_v58 = vld [vmem:[%s1849_s20 + $0x6e0] sm:$0xff] }
  0xd3   : > { %1200 = vst [vmem:[%s1892_s1 + $0x508] sm:$0xff] %v944_v20  ;;  %v964_v20 = vadd.f32 %v1867_v7, %v702_v9  ;;  %v722_v9 = vmul.f32 %v1865_v6, %v460_v61  ;;  %v480_v61 = vld [vmem:[%s1849_s20 + $0x6e8] sm:$0xff] }
  0xd4   : > { %1201 = vst [vmem:[%s1892_s1 + $0x510] sm:$0xff] %v945_v23  ;;  %v965_v23 = vadd.f32 %v1862_v4, %v703_v12  ;;  %v723_v12 = vmul.f32 %v1860_v3, %v461_v0  ;;  %v481_v0 = vld [vmem:[%s1849_s20 + $0x6f0] sm:$0xff] }
  0xd5   : > { %1202 = vst [vmem:[%s1892_s1 + $0x518] sm:$0xff] %v946_v26  ;;  %v966_v26 = vadd.f32 %v1867_v7, %v704_v15  ;;  %v724_v15 = vmul.f32 %v1865_v6, %v462_v5  ;;  %v482_v5 = vld [vmem:[%s1849_s20 + $0x6f8] sm:$0xff] }
  0xd6   : > { %1203 = vst [vmem:[%s1892_s1 + $0x520] sm:$0xff] %v947_v29  ;;  %v967_v29 = vadd.f32 %v1862_v4, %v705_v18  ;;  %v725_v18 = vmul.f32 %v1860_v3, %v463_v10  ;;  %v483_v10 = vld [vmem:[%s1849_s20 + $0x700] sm:$0xff] }
  0xd7   : > { %1204 = vst [vmem:[%s1892_s1 + $0x528] sm:$0xff] %v948_v32  ;;  %v968_v32 = vadd.f32 %v1867_v7, %v706_v21  ;;  %v726_v21 = vmul.f32 %v1865_v6, %v464_v13  ;;  %v484_v13 = vld [vmem:[%s1849_s20 + $0x708] sm:$0xff] }
  0xd8   : > { %1205 = vst [vmem:[%s1892_s1 + $0x530] sm:$0xff] %v949_v35  ;;  %v969_v35 = vadd.f32 %v1862_v4, %v707_v24  ;;  %v727_v24 = vmul.f32 %v1860_v3, %v465_v16  ;;  %v485_v16 = vld [vmem:[%s1849_s20 + $0x710] sm:$0xff] }
  0xd9   : > { %1206 = vst [vmem:[%s1892_s1 + $0x538] sm:$0xff] %v950_v38  ;;  %v970_v38 = vadd.f32 %v1867_v7, %v708_v27  ;;  %v728_v27 = vmul.f32 %v1865_v6, %v466_v19  ;;  %v486_v19 = vld [vmem:[%s1849_s20 + $0x718] sm:$0xff] }
  0xda   : > { %1207 = vst [vmem:[%s1892_s1 + $0x540] sm:$0xff] %v951_v41  ;;  %v971_v41 = vadd.f32 %v1862_v4, %v709_v30  ;;  %v729_v30 = vmul.f32 %v1860_v3, %v467_v22  ;;  %v487_v22 = vld [vmem:[%s1849_s20 + $0x720] sm:$0xff] }
  0xdb   : > { %1208 = vst [vmem:[%s1892_s1 + $0x548] sm:$0xff] %v952_v44  ;;  %v972_v44 = vadd.f32 %v1867_v7, %v710_v33  ;;  %v730_v33 = vmul.f32 %v1865_v6, %v468_v25  ;;  %v488_v25 = vld [vmem:[%s1849_s20 + $0x728] sm:$0xff] }
  0xdc   : > { %1209 = vst [vmem:[%s1892_s1 + $0x550] sm:$0xff] %v953_v47  ;;  %v973_v47 = vadd.f32 %v1862_v4, %v711_v36  ;;  %v731_v36 = vmul.f32 %v1860_v3, %v469_v28  ;;  %v489_v28 = vld [vmem:[%s1849_s20 + $0x730] sm:$0xff] }
  0xdd   : > { %1210 = vst [vmem:[%s1892_s1 + $0x558] sm:$0xff] %v954_v50  ;;  %v974_v50 = vadd.f32 %v1867_v7, %v712_v39  ;;  %v732_v39 = vmul.f32 %v1865_v6, %v470_v31  ;;  %v490_v31 = vld [vmem:[%s1849_s20 + $0x738] sm:$0xff] }
  0xde   : > { %1211 = vst [vmem:[%s1892_s1 + $0x560] sm:$0xff] %v955_v53  ;;  %v975_v53 = vadd.f32 %v1862_v4, %v713_v42  ;;  %v733_v42 = vmul.f32 %v1860_v3, %v471_v34  ;;  %v491_v34 = vld [vmem:[%s1849_s20 + $0x740] sm:$0xff] }
  0xdf   : > { %1212 = vst [vmem:[%s1892_s1 + $0x568] sm:$0xff] %v956_v56  ;;  %v976_v56 = vadd.f32 %v1867_v7, %v714_v45  ;;  %v734_v45 = vmul.f32 %v1865_v6, %v472_v37  ;;  %v492_v37 = vld [vmem:[%s1849_s20 + $0x748] sm:$0xff] }
  0xe0   : > { %1213 = vst [vmem:[%s1892_s1 + $0x570] sm:$0xff] %v957_v59  ;;  %v977_v59 = vadd.f32 %v1862_v4, %v715_v48  ;;  %v735_v48 = vmul.f32 %v1860_v3, %v473_v40  ;;  %v493_v40 = vld [vmem:[%s1849_s20 + $0x750] sm:$0xff] }
  0xe1   : > { %1214 = vst [vmem:[%s1892_s1 + $0x578] sm:$0xff] %v958_v62  ;;  %v978_v62 = vadd.f32 %v1867_v7, %v716_v51  ;;  %v736_v51 = vmul.f32 %v1865_v6, %v474_v43  ;;  %v494_v43 = vld [vmem:[%s1849_s20 + $0x758] sm:$0xff] }
  0xe2   : > { %1215 = vst [vmem:[%s1892_s1 + $0x580] sm:$0xff] %v959_v1  ;;  %v979_v1 = vadd.f32 %v1862_v4, %v717_v54  ;;  %v737_v54 = vmul.f32 %v1860_v3, %v475_v46  ;;  %v495_v46 = vld [vmem:[%s1849_s20 + $0x760] sm:$0xff] }
  0xe3   : > { %1216 = vst [vmem:[%s1892_s1 + $0x588] sm:$0xff] %v960_v8  ;;  %v980_v8 = vadd.f32 %v1867_v7, %v718_v57  ;;  %v738_v57 = vmul.f32 %v1865_v6, %v476_v49  ;;  %v496_v49 = vld [vmem:[%s1849_s20 + $0x768] sm:$0xff] }
  0xe4   : > { %1217 = vst [vmem:[%s1892_s1 + $0x590] sm:$0xff] %v961_v11  ;;  %v981_v11 = vadd.f32 %v1862_v4, %v719_v60  ;;  %v739_v60 = vmul.f32 %v1860_v3, %v477_v52  ;;  %v497_v52 = vld [vmem:[%s1849_s20 + $0x770] sm:$0xff] }
  0xe5   : > { %1218 = vst [vmem:[%s1892_s1 + $0x598] sm:$0xff] %v962_v14  ;;  %v982_v14 = vadd.f32 %v1867_v7, %v720_v63  ;;  %v740_v63 = vmul.f32 %v1865_v6, %v478_v55  ;;  %v498_v55 = vld [vmem:[%s1849_s20 + $0x778] sm:$0xff] }
  0xe6   : > { %1219 = vst [vmem:[%s1892_s1 + $0x5a0] sm:$0xff] %v963_v17  ;;  %v983_v17 = vadd.f32 %v1862_v4, %v721_v2  ;;  %v741_v2 = vmul.f32 %v1860_v3, %v479_v58  ;;  %v499_v58 = vld [vmem:[%s1849_s20 + $0x780] sm:$0xff] }
  0xe7   : > { %1220 = vst [vmem:[%s1892_s1 + $0x5a8] sm:$0xff] %v964_v20  ;;  %v984_v20 = vadd.f32 %v1867_v7, %v722_v9  ;;  %v742_v9 = vmul.f32 %v1865_v6, %v480_v61  ;;  %v500_v61 = vld [vmem:[%s1849_s20 + $0x788] sm:$0xff] }
  0xe8   : > { %1221 = vst [vmem:[%s1892_s1 + $0x5b0] sm:$0xff] %v965_v23  ;;  %v985_v23 = vadd.f32 %v1862_v4, %v723_v12  ;;  %v743_v12 = vmul.f32 %v1860_v3, %v481_v0  ;;  %v501_v0 = vld [vmem:[%s1849_s20 + $0x790] sm:$0xff] }
  0xe9   : > { %1222 = vst [vmem:[%s1892_s1 + $0x5b8] sm:$0xff] %v966_v26  ;;  %v986_v26 = vadd.f32 %v1867_v7, %v724_v15  ;;  %v744_v15 = vmul.f32 %v1865_v6, %v482_v5  ;;  %v502_v5 = vld [vmem:[%s1849_s20 + $0x798] sm:$0xff] }
  0xea   : > { %1223 = vst [vmem:[%s1892_s1 + $0x5c0] sm:$0xff] %v967_v29  ;;  %v987_v29 = vadd.f32 %v1862_v4, %v725_v18  ;;  %v745_v18 = vmul.f32 %v1860_v3, %v483_v10  ;;  %v503_v10 = vld [vmem:[%s1849_s20 + $0x7a0] sm:$0xff] }
  0xeb   : > { %1224 = vst [vmem:[%s1892_s1 + $0x5c8] sm:$0xff] %v968_v32  ;;  %v988_v32 = vadd.f32 %v1867_v7, %v726_v21  ;;  %v746_v21 = vmul.f32 %v1865_v6, %v484_v13  ;;  %v504_v13 = vld [vmem:[%s1849_s20 + $0x7a8] sm:$0xff] }
  0xec   : > { %1225 = vst [vmem:[%s1892_s1 + $0x5d0] sm:$0xff] %v969_v35  ;;  %v989_v35 = vadd.f32 %v1862_v4, %v727_v24  ;;  %v747_v24 = vmul.f32 %v1860_v3, %v485_v16  ;;  %v505_v16 = vld [vmem:[%s1849_s20 + $0x7b0] sm:$0xff] }
  0xed   : > { %1226 = vst [vmem:[%s1892_s1 + $0x5d8] sm:$0xff] %v970_v38  ;;  %v990_v38 = vadd.f32 %v1867_v7, %v728_v27  ;;  %v748_v27 = vmul.f32 %v1865_v6, %v486_v19  ;;  %v506_v19 = vld [vmem:[%s1849_s20 + $0x7b8] sm:$0xff] }
  0xee   : > { %1227 = vst [vmem:[%s1892_s1 + $0x5e0] sm:$0xff] %v971_v41  ;;  %v991_v41 = vadd.f32 %v1862_v4, %v729_v30  ;;  %v749_v30 = vmul.f32 %v1860_v3, %v487_v22  ;;  %v507_v22 = vld [vmem:[%s1849_s20 + $0x7c0] sm:$0xff] }
  0xef   : > { %1228 = vst [vmem:[%s1892_s1 + $0x5e8] sm:$0xff] %v972_v44  ;;  %v992_v44 = vadd.f32 %v1867_v7, %v730_v33  ;;  %v750_v33 = vmul.f32 %v1865_v6, %v488_v25  ;;  %v508_v25 = vld [vmem:[%s1849_s20 + $0x7c8] sm:$0xff] }
  0xf0   : > { %1229 = vst [vmem:[%s1892_s1 + $0x5f0] sm:$0xff] %v973_v47  ;;  %v993_v47 = vadd.f32 %v1862_v4, %v731_v36  ;;  %v751_v36 = vmul.f32 %v1860_v3, %v489_v28  ;;  %v509_v28 = vld [vmem:[%s1849_s20 + $0x7d0] sm:$0xff] }
  0xf1   : > { %1230 = vst [vmem:[%s1892_s1 + $0x5f8] sm:$0xff] %v974_v50  ;;  %v994_v50 = vadd.f32 %v1867_v7, %v732_v39  ;;  %v752_v39 = vmul.f32 %v1865_v6, %v490_v31  ;;  %v510_v31 = vld [vmem:[%s1849_s20 + $0x7d8] sm:$0xff] }
  0xf2   : > { %1231 = vst [vmem:[%s1892_s1 + $0x600] sm:$0xff] %v975_v53  ;;  %v995_v53 = vadd.f32 %v1862_v4, %v733_v42  ;;  %v753_v42 = vmul.f32 %v1860_v3, %v491_v34  ;;  %v511_v34 = vld [vmem:[%s1849_s20 + $0x7e0] sm:$0xff] }
  0xf3   : > { %1232 = vst [vmem:[%s1892_s1 + $0x608] sm:$0xff] %v976_v56  ;;  %v996_v56 = vadd.f32 %v1867_v7, %v734_v45  ;;  %v754_v45 = vmul.f32 %v1865_v6, %v492_v37  ;;  %v512_v37 = vld [vmem:[%s1849_s20 + $0x7e8] sm:$0xff] }
  0xf4   : > { %1233 = vst [vmem:[%s1892_s1 + $0x610] sm:$0xff] %v977_v59  ;;  %v997_v59 = vadd.f32 %v1862_v4, %v735_v48  ;;  %v755_v48 = vmul.f32 %v1860_v3, %v493_v40  ;;  %v513_v40 = vld [vmem:[%s1849_s20 + $0x7f0] sm:$0xff] }
  0xf5   : > { %1234 = vst [vmem:[%s1892_s1 + $0x618] sm:$0xff] %v978_v62  ;;  %v998_v62 = vadd.f32 %v1867_v7, %v736_v51  ;;  %v756_v51 = vmul.f32 %v1865_v6, %v494_v43  ;;  %v514_v43 = vld [vmem:[%s1849_s20 + $0x7f8] sm:$0xff] }
  0xf6   : > { %1235 = vst [vmem:[%s1892_s1 + $0x620] sm:$0xff] %v979_v1  ;;  %v999_v1 = vadd.f32 %v1862_v4, %v737_v54  ;;  %v757_v54 = vmul.f32 %v1860_v3, %v495_v46 }
  0xf7   : > { %1236 = vst [vmem:[%s1892_s1 + $0x628] sm:$0xff] %v980_v8  ;;  %v1000_v8 = vadd.f32 %v1867_v7, %v738_v57  ;;  %v758_v57 = vmul.f32 %v1865_v6, %v496_v49  ;;  %v776_v49 = vmul.f32 %v1865_v6, %v514_v43 }
  0xf8   : > { %1237 = vst [vmem:[%s1892_s1 + $0x630] sm:$0xff] %v981_v11  ;;  %v1001_v11 = vadd.f32 %v1862_v4, %v739_v60  ;;  %v759_v60 = vmul.f32 %v1860_v3, %v497_v52 }
  0xf9   : > { %1238 = vst [vmem:[%s1892_s1 + $0x638] sm:$0xff] %v982_v14  ;;  %v1002_v14 = vadd.f32 %v1867_v7, %v740_v63  ;;  %v760_v63 = vmul.f32 %v1865_v6, %v498_v55  ;;  %v1038_v52 = vadd.f32 %v1867_v7, %v776_v49 }
  0xfa   : > { %1239 = vst [vmem:[%s1892_s1 + $0x640] sm:$0xff] %v983_v17  ;;  %v1003_v17 = vadd.f32 %v1862_v4, %v741_v2  ;;  %v761_v2 = vmul.f32 %v1860_v3, %v499_v58 }
  0xfb   : > { %1240 = vst [vmem:[%s1892_s1 + $0x648] sm:$0xff] %v984_v20  ;;  %v1004_v20 = vadd.f32 %v1867_v7, %v742_v9  ;;  %v762_v9 = vmul.f32 %v1865_v6, %v500_v61 }
  0xfc   : > { %1241 = vst [vmem:[%s1892_s1 + $0x650] sm:$0xff] %v985_v23  ;;  %v1005_v23 = vadd.f32 %v1862_v4, %v743_v12  ;;  %v763_v12 = vmul.f32 %v1860_v3, %v501_v0 }
  0xfd   : > { %1242 = vst [vmem:[%s1892_s1 + $0x658] sm:$0xff] %v986_v26  ;;  %v1006_v26 = vadd.f32 %v1867_v7, %v744_v15  ;;  %v764_v15 = vmul.f32 %v1865_v6, %v502_v5 }
  0xfe   : > { %1243 = vst [vmem:[%s1892_s1 + $0x660] sm:$0xff] %v987_v29  ;;  %v1007_v29 = vadd.f32 %v1862_v4, %v745_v18  ;;  %v765_v18 = vmul.f32 %v1860_v3, %v503_v10 }
  0xff   : > { %1244 = vst [vmem:[%s1892_s1 + $0x668] sm:$0xff] %v988_v32  ;;  %v1008_v32 = vadd.f32 %v1867_v7, %v746_v21  ;;  %v766_v21 = vmul.f32 %v1865_v6, %v504_v13 }
 0x100   : > { %1245 = vst [vmem:[%s1892_s1 + $0x670] sm:$0xff] %v989_v35  ;;  %v1009_v35 = vadd.f32 %v1862_v4, %v747_v24  ;;  %v767_v24 = vmul.f32 %v1860_v3, %v505_v16 }
 0x101   : > { %1246 = vst [vmem:[%s1892_s1 + $0x678] sm:$0xff] %v990_v38  ;;  %v1010_v38 = vadd.f32 %v1867_v7, %v748_v27  ;;  %v768_v27 = vmul.f32 %v1865_v6, %v506_v19 }
 0x102   : > { %1247 = vst [vmem:[%s1892_s1 + $0x680] sm:$0xff] %v991_v41  ;;  %v1011_v41 = vadd.f32 %v1862_v4, %v749_v30  ;;  %v769_v30 = vmul.f32 %v1860_v3, %v507_v22 }
 0x103   : > { %1248 = vst [vmem:[%s1892_s1 + $0x688] sm:$0xff] %v992_v44  ;;  %v1012_v44 = vadd.f32 %v1867_v7, %v750_v33  ;;  %v770_v33 = vmul.f32 %v1865_v6, %v508_v25 }
 0x104   : > { %1249 = vst [vmem:[%s1892_s1 + $0x690] sm:$0xff] %v993_v47  ;;  %v1013_v47 = vadd.f32 %v1862_v4, %v751_v36  ;;  %v771_v36 = vmul.f32 %v1860_v3, %v509_v28 }
 0x105   : > { %1250 = vst [vmem:[%s1892_s1 + $0x698] sm:$0xff] %v994_v50  ;;  %v1014_v50 = vadd.f32 %v1867_v7, %v752_v39  ;;  %v772_v39 = vmul.f32 %v1865_v6, %v510_v31 }
 0x106   : > { %1251 = vst [vmem:[%s1892_s1 + $0x6a0] sm:$0xff] %v995_v53  ;;  %v1015_v53 = vadd.f32 %v1862_v4, %v753_v42  ;;  %v773_v42 = vmul.f32 %v1860_v3, %v511_v34  ;;  %v1033_v46 = vadd.f32 %v1862_v4, %v771_v36 }
 0x107   : > { %1252 = vst [vmem:[%s1892_s1 + $0x6a8] sm:$0xff] %v996_v56  ;;  %v1016_v56 = vadd.f32 %v1867_v7, %v754_v45  ;;  %v774_v45 = vmul.f32 %v1865_v6, %v512_v37 }
 0x108   : > { %1253 = vst [vmem:[%s1892_s1 + $0x6b0] sm:$0xff] %v997_v59  ;;  %v1017_v59 = vadd.f32 %v1862_v4, %v755_v48  ;;  %v1034_v48 = vadd.f32 %v1867_v7, %v772_v39 }
 0x109   : > { %1254 = vst [vmem:[%s1892_s1 + $0x6b8] sm:$0xff] %v998_v62  ;;  %v1018_v62 = vadd.f32 %v1867_v7, %v756_v51  ;;  %v1036_v51 = vadd.f32 %v1867_v7, %v774_v45 }
 0x10a   : > { %1255 = vst [vmem:[%s1892_s1 + $0x6c0] sm:$0xff] %v999_v1  ;;  %v1019_v1 = vadd.f32 %v1862_v4, %v757_v54 }
 0x10b   : > { %1256 = vst [vmem:[%s1892_s1 + $0x6c8] sm:$0xff] %v1000_v8  ;;  %v1020_v8 = vadd.f32 %v1867_v7, %v758_v57 }
 0x10c   : > { %1257 = vst [vmem:[%s1892_s1 + $0x6d0] sm:$0xff] %v1001_v11  ;;  %v1021_v11 = vadd.f32 %v1862_v4, %v759_v60 }
 0x10d   : > { %1258 = vst [vmem:[%s1892_s1 + $0x6d8] sm:$0xff] %v1002_v14  ;;  %v1022_v14 = vadd.f32 %v1867_v7, %v760_v63 }
 0x10e   : > { %1259 = vst [vmem:[%s1892_s1 + $0x6e0] sm:$0xff] %v1003_v17  ;;  %v1023_v17 = vadd.f32 %v1862_v4, %v761_v2 }
 0x10f   : > { %1260 = vst [vmem:[%s1892_s1 + $0x6e8] sm:$0xff] %v1004_v20  ;;  %v1024_v20 = vadd.f32 %v1867_v7, %v762_v9 }
 0x110   : > { %1261 = vst [vmem:[%s1892_s1 + $0x6f0] sm:$0xff] %v1005_v23  ;;  %v1025_v23 = vadd.f32 %v1862_v4, %v763_v12 }
 0x111   : > { %1262 = vst [vmem:[%s1892_s1 + $0x6f8] sm:$0xff] %v1006_v26  ;;  %v1026_v26 = vadd.f32 %v1867_v7, %v764_v15 }
 0x112   : > { %1263 = vst [vmem:[%s1892_s1 + $0x700] sm:$0xff] %v1007_v29  ;;  %v1027_v29 = vadd.f32 %v1862_v4, %v765_v18 }
 0x113   : > { %1264 = vst [vmem:[%s1892_s1 + $0x708] sm:$0xff] %v1008_v32  ;;  %v1028_v32 = vadd.f32 %v1867_v7, %v766_v21 }
 0x114   : > { %1265 = vst [vmem:[%s1892_s1 + $0x710] sm:$0xff] %v1009_v35  ;;  %v1029_v35 = vadd.f32 %v1862_v4, %v767_v24 }
 0x115   : > { %1266 = vst [vmem:[%s1892_s1 + $0x718] sm:$0xff] %v1010_v38  ;;  %v1030_v38 = vadd.f32 %v1867_v7, %v768_v27 }
 0x116   : > { %1267 = vst [vmem:[%s1892_s1 + $0x720] sm:$0xff] %v1011_v41  ;;  %v1031_v41 = vadd.f32 %v1862_v4, %v769_v30 }
 0x117   : > { %1268 = vst [vmem:[%s1892_s1 + $0x728] sm:$0xff] %v1012_v44  ;;  %v1032_v44 = vadd.f32 %v1867_v7, %v770_v33 }
 0x118   : > { %1269 = vst [vmem:[%s1892_s1 + $0x730] sm:$0xff] %v1013_v47  ;;  %v775_v47 = vmul.f32 %v1860_v3, %v513_v40 }
 0x119   : > { %1270 = vst [vmem:[%s1892_s1 + $0x738] sm:$0xff] %v1014_v50  ;;  %v1035_v50 = vadd.f32 %v1862_v4, %v773_v42 }
 0x11a   : > { %1271 = vst [vmem:[%s1892_s1 + $0x740] sm:$0xff] %v1015_v53  ;;  %v1037_v3 = vadd.f32 %v1862_v4, %v775_v47 }
 0x11b   : > { %1272 = vst [vmem:[%s1892_s1 + $0x748] sm:$0xff] %v1016_v56 }
 0x11c   : > { %1273 = vst [vmem:[%s1892_s1 + $0x750] sm:$0xff] %v1017_v59 }
 0x11d   : > { %1274 = vst [vmem:[%s1892_s1 + $0x758] sm:$0xff] %v1018_v62 }
 0x11e   : > { %1275 = vst [vmem:[%s1892_s1 + $0x760] sm:$0xff] %v1019_v1 }
 0x11f   : > { %1276 = vst [vmem:[%s1892_s1 + $0x768] sm:$0xff] %v1020_v8 }
 0x120   : > { %1277 = vst [vmem:[%s1892_s1 + $0x770] sm:$0xff] %v1021_v11 }
 0x121   : > { %1278 = vst [vmem:[%s1892_s1 + $0x778] sm:$0xff] %v1022_v14 }
 0x122   : > { %1279 = vst [vmem:[%s1892_s1 + $0x780] sm:$0xff] %v1023_v17 }
 0x123   : > { %1280 = vst [vmem:[%s1892_s1 + $0x788] sm:$0xff] %v1024_v20 }
 0x124   : > { %1281 = vst [vmem:[%s1892_s1 + $0x790] sm:$0xff] %v1025_v23 }
 0x125   : > { %1282 = vst [vmem:[%s1892_s1 + $0x798] sm:$0xff] %v1026_v26 }
 0x126   : > { %1283 = vst [vmem:[%s1892_s1 + $0x7a0] sm:$0xff] %v1027_v29 }
 0x127   : > { %1284 = vst [vmem:[%s1892_s1 + $0x7a8] sm:$0xff] %v1028_v32 }
 0x128   : > { %1285 = vst [vmem:[%s1892_s1 + $0x7b0] sm:$0xff] %v1029_v35 }
 0x129   : > { %1286 = vst [vmem:[%s1892_s1 + $0x7b8] sm:$0xff] %v1030_v38 }
 0x12a   : > { %1287 = vst [vmem:[%s1892_s1 + $0x7c0] sm:$0xff] %v1031_v41 }
 0x12b   : > { %1288 = vst [vmem:[%s1892_s1 + $0x7c8] sm:$0xff] %v1032_v44 }
 0x12c   : > { %1289 = vst [vmem:[%s1892_s1 + $0x7d0] sm:$0xff] %v1033_v46 }
 0x12d   : > { %1290 = vst [vmem:[%s1892_s1 + $0x7d8] sm:$0xff] %v1034_v48 }
 0x12e   : > { %1291 = vst [vmem:[%s1892_s1 + $0x7e0] sm:$0xff] %v1035_v50 }
 0x12f   : > { %1292 = vst [vmem:[%s1892_s1 + $0x7e8] sm:$0xff] %v1036_v51 }
 0x130   : > { %1293 = vst [vmem:[%s1892_s1 + $0x7f0] sm:$0xff] %v1037_v3 }
 0x131   : > { %1294 = vst [vmem:[%s1892_s1 + $0x7f8] sm:$0xff] %v1038_v52 }
 0x132   : > { %1653 = shalt.err (!%p1650_p13)
}
 0x133   : > { %s1718_s19 = smov 256   ;;  %s1719_s26 = smov 16  }
 0x134   : > { %1459 = dma.vmem_to_hbm [thread:$0]  (%p1792_p8), %s1312_s8, 32768, %s1314_s11, %s1296_s22, %s1718_s19, %s1718_s19, %s1719_s26  }
 0x135 PF: > { %p1481_p0 = scmp.ge.s32.totalorder %s1712_s17, 2  ;;  %s1328_s27 = sand.u32 1, %s1692_s12  }
 0x136   : > { %s1329_s20 = scalar_lea.sflag [#allocation4], %s1328_s27 }
 0x137   : > { %p1473_p1 = pnand %p1481_p0, %p1796_p9 }
 0x139   : > { %p1474_p2 = pneg %p1473_p1 }
 0x13b   : > { %1687 = dma.done.wait (%p1474_p2), %s1329_s20, 32768  }
 0x13c   : > { %1689 = vsyncadd (%p1474_p2), %s1329_s20, 4294934528  ;;  %s20_s17 = sadd.s32 1, %s1712_s17   ;;  %s2946_s12 = smov %s1696_s13 }
 0x13d   : > { %p17_p4 = scmp.ge.s32.totalorder %s20_s17, 6   ;;  %s2947_s13 = smov %s1700_s14 }
 0x13e   : > { %s2948_s14 = smov %s1836_s7  ;;  %s2949_s15 = smov %s1708_s16 }
 0x13f   : > { %s2950_s16 = smov %s2952_s18  ;;  %19 = sbr.rel (!%p17_p4) target bundleno = 9 (0x9), region = 87 }
 0x144   :  { %1335 = vsyncpa [#allocation3], 1 }
 0x145   :  { %1337 = vsyncpa [#allocation3 + $0x1], 1 }
 0x146   :  { %1338 = vsyncpa [#allocation6], 1 }
 0x147   :  { %1339 = vsyncpa [#allocation4], 1 }
 0x148   :  { %1341 = vsyncpa [#allocation4 + $0x1], 1 }

</bundles_post_ra>
